<compile_context>
chip_gen: v7x
topology: tpu7x:2x2x1
jax: 0.10.0
libtpu: 0.0.40
codegen_flags: <defaults>
</compile_context>

<pallas_src>
import math

import jax
import jax.numpy as jnp
import numpy as np
from jax import lax
from jax.experimental import pallas as pl
from jax.experimental.pallas import tpu as pltpu

D_MODEL = 32
N_HEAD = 4
HEAD_DIM = D_MODEL // N_HEAD
N_QUBITS = 4
SEQ = 8
BATCH = 2
LN_EPS = 1e-5
PI = math.pi

# ---- parameter-slab row layout (all sub-blocks start on 8-row boundaries) ----
_ROW_WQKV = 0                     # (D, 3D)  fused [q|k|v] weights (q pre-scaled)
_ROW_WOUT = D_MODEL               # (D, D)   attention out-projection (in, out)
_ROW_WFFN = 2 * D_MODEL           # (8, D)   rows 0:Q input_proj, Q:2Q output_proj.T
_ROW_VEC = 2 * D_MODEL + 8        # (8, 3D)  bias / LayerNorm vectors
PARAM_ROWS = _ROW_VEC + 8         # 80
PARAM_COLS = 3 * D_MODEL          # 96


# ----------------------------------------------------------------------------
# Pallas kernel: full encoder layer on a (Bblk*SEQ, D_MODEL) row block.
# ----------------------------------------------------------------------------
def encoder_layer_kernel(x_ref, p_ref, o_ref):
    M, D = x_ref.shape                     # (Bblk*SEQ, 32)
    S, H, HD, Q = SEQ, N_HEAD, HEAD_DIM, N_QUBITS
    Bblk = M // S

    # ---- parameters: static 8-row-aligned ref slices, loaded once ----------
    w_qkv = p_ref[_ROW_WQKV:_ROW_WQKV + D, :]          # (32, 96)
    w_out = p_ref[_ROW_WOUT:_ROW_WOUT + D, 0:D]        # (32, 32)
    w_ffn = p_ref[_ROW_WFFN:_ROW_WFFN + 8, 0:D]        # (8, 32)
    w_in = w_ffn[0:Q]                                  # (4, 32) input_projection
    w_fo = w_ffn[Q:2 * Q]                              # (4, 32) output_projection.T
    vecs = p_ref[_ROW_VEC:_ROW_VEC + 8, :]             # (8, 96)
    b_qkv = vecs[0:1, :]                               # (1, 96)
    b_oa = vecs[1:2, 0:D]
    g1 = vecs[2:3, 0:D]
    be1 = vecs[3:4, 0:D]
    b_of = vecs[4:5, 0:D]
    g2 = vecs[5:6, 0:D]
    be2 = vecs[6:7, 0:D]
    b_in = vecs[7:8, 0:Q]                              # (1, 4)
    th_p = vecs[7:8, Q:2 * Q]                          # (1, 4)

    def layer_norm(h, g, b):
        mu = jnp.mean(h, axis=-1, keepdims=True)
        var = jnp.mean(jnp.square(h - mu), axis=-1, keepdims=True)
        return (h - mu) * lax.rsqrt(var + LN_EPS) * g + b

    x = x_ref[...]                                     # (M, 32) f32

    # ---- fused multi-head self-attention (dropout = identity in eval) ------
    qkv = jnp.dot(x, w_qkv, preferred_element_type=jnp.float32) + b_qkv   # (M, 96)

    def split_heads(sect):
        # (M, 96) lane slices -> (H*Bblk, S, HD), batch index g = h*Bblk + b
        parts = []
        for h in range(H):
            col0 = sect * D + h * HD
            parts.append(qkv[:, col0:col0 + HD].reshape(Bblk, S, HD))
        return jnp.concatenate(parts, axis=0)

    q = split_heads(0)                                 # already scaled by 1/sqrt(HD)
    k = split_heads(1)
    v = split_heads(2)

    s = jnp.einsum("gqd,gkd->gqk", q, k,
                   preferred_element_type=jnp.float32)                 # (G, S, S)
    s = s - jnp.max(s, axis=-1, keepdims=True)
    e = jnp.exp(s)
    probs = e * pl.reciprocal(jnp.sum(e, axis=-1, keepdims=True), approx=True)
    pv = jnp.einsum("gqk,gkd->gqd", probs, v,
                    preferred_element_type=jnp.float32)                # (G, S, HD)

    # reassemble heads onto lanes -> (M, D), then one merged out-projection
    ctx = jnp.concatenate([pv[h * Bblk:(h + 1) * Bblk] for h in range(H)],
                          axis=-1).reshape(M, D)                       # (M, 32)
    attn = jnp.dot(ctx, w_out, preferred_element_type=jnp.float32) + b_oa

    # ---- residual + LayerNorm 1 ---------------------------------------------
    h1 = layer_norm(x + attn, g1, be1)

    # ---- quantum feed-forward (analytic 4-qubit circuit) --------------------
    xp = lax.dot_general(h1, w_in, (((1,), (1,)), ((), ())),
                         preferred_element_type=jnp.float32) + b_in    # (M, 4)
    mn = jnp.min(xp, axis=-1, keepdims=True)
    mx = jnp.max(xp, axis=-1, keepdims=True)
    theta = (xp - mn) * pl.reciprocal(mx - mn + 1e-8, approx=True) \
            * jnp.float32(PI) + th_p
    c = jnp.cos(theta)
    c0, c1, c2, c3 = c[:, 0:1], c[:, 1:2], c[:, 2:3], c[:, 3:4]
    e1 = c0 * c1                      # <Z1>
    e2 = e1 * c2                      # <Z2>
    e3 = e2 * c3                      # <Z3>
    e0 = c1 * c2 * c3                 # <Z0>
    qout = jnp.concatenate([e0, e1, e2, e3], axis=-1)                  # (M, 4)
    out2 = jnp.dot(qout, w_fo, preferred_element_type=jnp.float32) + b_of

    # ---- residual + LayerNorm 2 ---------------------------------------------
    o_ref[...] = layer_norm(h1 + out2, g2, be2)


# ----------------------------------------------------------------------------
# Host-side parameter packing: everything into one (80, 96) f32 slab.
# ----------------------------------------------------------------------------
def pack_params(p):
    D, Q = D_MODEL, N_QUBITS
    scale = jnp.float32(1.0 / math.sqrt(HEAD_DIM))

    # fused [q|k|v] projection, torch (out,in) -> (in,out); scale folded into q
    w_qkv = jnp.concatenate([(p["wq"] * scale).T, p["wk"].T, p["wv"].T],
                            axis=1).astype(jnp.float32)                # (D, 3D)
    b_qkv = jnp.concatenate([p["bq"] * scale, p["bk"], p["bv"]],
                            axis=1).astype(jnp.float32)                # (1, 3D)

    P = jnp.zeros((PARAM_ROWS, PARAM_COLS), jnp.float32)
    P = P.at[_ROW_WQKV:_ROW_WQKV + D, :].set(w_qkv)
    P = P.at[_ROW_WOUT:_ROW_WOUT + D, 0:D].set(p["wo_attn"].T.astype(jnp.float32))
    P = P.at[_ROW_WFFN:_ROW_WFFN + Q, 0:D].set(p["wi"].astype(jnp.float32))
    P = P.at[_ROW_WFFN + Q:_ROW_WFFN + 2 * Q, 0:D].set(p["wot"].astype(jnp.float32))
    r = _ROW_VEC
    P = P.at[r + 0, :].set(b_qkv[0])
    P = P.at[r + 1, 0:D].set(p["bo_attn"][0].astype(jnp.float32))
    P = P.at[r + 2, 0:D].set(p["g1"][0].astype(jnp.float32))
    P = P.at[r + 3, 0:D].set(p["beta1"][0].astype(jnp.float32))
    P = P.at[r + 4, 0:D].set(p["bo_ffn"][0].astype(jnp.float32))
    P = P.at[r + 5, 0:D].set(p["g2"][0].astype(jnp.float32))
    P = P.at[r + 6, 0:D].set(p["beta2"][0].astype(jnp.float32))
    P = P.at[r + 7, 0:Q].set(p["bi"][0].astype(jnp.float32))
    P = P.at[r + 7, Q:2 * Q].set(p["ffn_params"][0].astype(jnp.float32))
    return P


def _two_tensorcores():
    """True on chips with 2 TensorCores (v7x): shard the batch across them."""
    try:
        kind = jax.devices()[0].device_kind.lower()
    except Exception:
        return False
    return "v7" in kind


# ----------------------------------------------------------------------------
# Wrapper
# ----------------------------------------------------------------------------
def quantum_encoder_layer(x, params):
    B, S, D = x.shape
    x_flat = x.reshape(B * S, D).astype(jnp.float32)
    pslab = pack_params(params)

    if _two_tensorcores() and B > 1:
        grid = (B,)                 # one batch element per TensorCore on v7x
        row_block = S
        semantics = ("parallel",)
    else:
        grid = (1,)                 # single step: whole problem fits in VMEM
        row_block = B * S
        semantics = ("arbitrary",)

    out_flat = pl.pallas_call(
        encoder_layer_kernel,
        out_shape=jax.ShapeDtypeStruct((B * S, D), jnp.float32),
        grid=grid,
        in_specs=[
            pl.BlockSpec((row_block, D), lambda i: (i, 0)),
            pl.BlockSpec((PARAM_ROWS, PARAM_COLS), lambda i: (0, 0)),
        ],
        out_specs=pl.BlockSpec((row_block, D), lambda i: (i, 0)),
        compiler_params=pltpu.CompilerParams(dimension_semantics=semantics),
    )(x_flat, pslab)
    return out_flat.reshape(B, S, D)


# ----------------------------------------------------------------------------
# Pure-JAX reference (same math, for a correctness check)
# ----------------------------------------------------------------------------
def _layernorm(h, g, b):
    mu = jnp.mean(h, axis=-1, keepdims=True)
    var = jnp.mean((h - mu) ** 2, axis=-1, keepdims=True)
    return (h - mu) * lax.rsqrt(var + LN_EPS) * g + b


def reference(x, p):
    B, S, D = x.shape
    q = jnp.einsum("bsd,ed->bse", x, p["wq"]) + p["bq"]
    k = jnp.einsum("bsd,ed->bse", x, p["wk"]) + p["bk"]
    v = jnp.einsum("bsd,ed->bse", x, p["wv"]) + p["bv"]
    qh = q.reshape(B, S, N_HEAD, HEAD_DIM).transpose(0, 2, 1, 3)
    kh = k.reshape(B, S, N_HEAD, HEAD_DIM).transpose(0, 2, 1, 3)
    vh = v.reshape(B, S, N_HEAD, HEAD_DIM).transpose(0, 2, 1, 3)
    scores = jnp.einsum("bhqd,bhkd->bhqk", qh, kh) / math.sqrt(HEAD_DIM)
    pw = jax.nn.softmax(scores, axis=-1)
    ao = jnp.einsum("bhqk,bhkd->bhqd", pw, vh).transpose(0, 2, 1, 3).reshape(B, S, D)
    ao = jnp.einsum("bsd,ed->bse", ao, p["wo_attn"]) + p["bo_attn"]
    h1 = _layernorm(x + ao, p["g1"], p["beta1"])

    xp = jnp.einsum("bsd,qd->bsq", h1, p["wi"]) + p["bi"]
    mn = xp.min(-1, keepdims=True)
    mx = xp.max(-1, keepdims=True)
    theta = (xp - mn) / (mx - mn + 1e-8) * PI + p["ffn_params"]
    c = jnp.cos(theta)
    c0, c1, c2, c3 = c[..., 0], c[..., 1], c[..., 2], c[..., 3]
    qout = jnp.stack([c1 * c2 * c3, c0 * c1, c0 * c1 * c2, c0 * c1 * c2 * c3],
                     axis=-1)
    out2 = jnp.einsum("bsq,qd->bsd", qout, p["wot"]) + p["bo_ffn"]
    return _layernorm(h1 + out2, p["g2"], p["beta2"])


# ----------------------------------------------------------------------------
# Deterministic parameter init (synthetic weights; no checkpoint load)
# ----------------------------------------------------------------------------
def init_params(key):
    ks = jax.random.split(key, 16)

    def nrm(k, shape, scale=0.1):
        return (scale * jax.random.normal(k, shape)).astype(jnp.float32)

    D, Q = D_MODEL, N_QUBITS
    return {
        # attention in_proj (split q/k/v) and out_proj, torch (out, in) layout
        "wq": nrm(ks[0], (D, D)), "wk": nrm(ks[1], (D, D)), "wv": nrm(ks[2], (D, D)),
        "bq": nrm(ks[3], (1, D)), "bk": nrm(ks[4], (1, D)), "bv": nrm(ks[5], (1, D)),
        "wo_attn": nrm(ks[6], (D, D)), "bo_attn": nrm(ks[7], (1, D)),
        # LayerNorm 1 / 2 (PyTorch default init)
        "g1": jnp.ones((1, D), jnp.float32), "beta1": jnp.zeros((1, D), jnp.float32),
        "g2": jnp.ones((1, D), jnp.float32), "beta2": jnp.zeros((1, D), jnp.float32),
        # quantum FFN: input_projection (Q x D); output_projection stored transposed (Q x D)
        "wi": nrm(ks[8], (Q, D)), "bi": nrm(ks[9], (1, Q)),
        "wot": nrm(ks[10], (Q, D)), "bo_ffn": nrm(ks[11], (1, D)),
        "ffn_params": nrm(ks[12], (1, Q)),  # torch.randn(n_qubits) * 0.1
    }


if __name__ == "__main__":
    key = jax.random.PRNGKey(0)
    pkey, xkey = jax.random.split(key)
    params = init_params(pkey)
    x = jax.random.normal(xkey, (BATCH, SEQ, D_MODEL), dtype=jnp.float32)

    fwd = jax.jit(quantum_encoder_layer)
    out = jax.block_until_ready(fwd(x, params))
    ref = jax.block_until_ready(reference(x, params))

    err = float(jnp.max(jnp.abs(out - ref)))
    assert out.shape == (BATCH, SEQ, D_MODEL)
    assert np.isfinite(np.asarray(out)).all()
    assert err < 5e-2, f"mismatch vs reference: {err}"
    print("KERNEL_OK")
</pallas_src>

<mosaic_0001>
module attributes {stable_mosaic.version = 11 : i64} {
  func.func @encoder_layer_kernel(%arg0: i32, %arg1: memref<16x32xf32, #tpu.memory_space<vmem>>, %arg2: memref<80x96xf32, #tpu.memory_space<vmem>>, %arg3: memref<16x32xf32, #tpu.memory_space<vmem>>) attributes {dimension_semantics = [#tpu.dimension_semantics<arbitrary>], iteration_bounds = array<i64: 1>, scalar_prefetch = 0 : i64, scratch_operands = 0 : i64, tpu.core_type = #tpu.core_type<tc>, window_params = [{transform_indices = @transform_0, window_bounds = array<i64: 16, 32>}, {pipeline_mode = #tpu.pipeline_mode<synchronous>, transform_indices = @transform_1, window_bounds = array<i64: 80, 96>}, {transform_indices = @transform_2, window_bounds = array<i64: 16, 32>}]} {
    %c0 = arith.constant 0 : index
    %c0_0 = arith.constant 0 : index
    %0 = vector.load %arg2[%c0, %c0_0] : memref<80x96xf32, #tpu.memory_space<vmem>>, vector<32x96xf32>
    %c32 = arith.constant 32 : index
    %c0_1 = arith.constant 0 : index
    %1 = vector.load %arg2[%c32, %c0_1] : memref<80x96xf32, #tpu.memory_space<vmem>>, vector<32x32xf32>
    %c64 = arith.constant 64 : index
    %c0_2 = arith.constant 0 : index
    %2 = vector.load %arg2[%c64, %c0_2] : memref<80x96xf32, #tpu.memory_space<vmem>>, vector<8x32xf32>
    %3 = vector.extract_strided_slice %2 {offsets = [0, 0], sizes = [4, 32], strides = [1, 1]} : vector<8x32xf32> to vector<4x32xf32>
    %4 = vector.extract_strided_slice %2 {offsets = [4, 0], sizes = [4, 32], strides = [1, 1]} : vector<8x32xf32> to vector<4x32xf32>
    %c72 = arith.constant 72 : index
    %c0_3 = arith.constant 0 : index
    %5 = vector.load %arg2[%c72, %c0_3] : memref<80x96xf32, #tpu.memory_space<vmem>>, vector<8x96xf32>
    %6 = vector.extract_strided_slice %5 {offsets = [0, 0], sizes = [1, 96], strides = [1, 1]} : vector<8x96xf32> to vector<1x96xf32>
    %7 = vector.extract_strided_slice %5 {offsets = [1, 0], sizes = [1, 32], strides = [1, 1]} : vector<8x96xf32> to vector<1x32xf32>
    %8 = vector.extract_strided_slice %5 {offsets = [2, 0], sizes = [1, 32], strides = [1, 1]} : vector<8x96xf32> to vector<1x32xf32>
    %9 = vector.extract_strided_slice %5 {offsets = [3, 0], sizes = [1, 32], strides = [1, 1]} : vector<8x96xf32> to vector<1x32xf32>
    %10 = vector.extract_strided_slice %5 {offsets = [4, 0], sizes = [1, 32], strides = [1, 1]} : vector<8x96xf32> to vector<1x32xf32>
    %11 = vector.extract_strided_slice %5 {offsets = [5, 0], sizes = [1, 32], strides = [1, 1]} : vector<8x96xf32> to vector<1x32xf32>
    %12 = vector.extract_strided_slice %5 {offsets = [6, 0], sizes = [1, 32], strides = [1, 1]} : vector<8x96xf32> to vector<1x32xf32>
    %13 = vector.extract_strided_slice %5 {offsets = [7, 0], sizes = [1, 4], strides = [1, 1]} : vector<8x96xf32> to vector<1x4xf32>
    %14 = vector.extract_strided_slice %5 {offsets = [7, 4], sizes = [1, 4], strides = [1, 1]} : vector<8x96xf32> to vector<1x4xf32>
    %c0_4 = arith.constant 0 : index
    %c0_5 = arith.constant 0 : index
    %15 = vector.load %arg1[%c0_4, %c0_5] : memref<16x32xf32, #tpu.memory_space<vmem>>, vector<16x32xf32>
    %cst = arith.constant dense<0.000000e+00> : vector<16x96xf32>
    %16 = tpu.matmul %15, %0, %cst {dimension_numbers = #tpu.dot_dimension_numbers<[1], [0], [0], [1], [0, 0, 1, 1], [], []>} : vector<16x32xf32>, vector<32x96xf32>, vector<16x96xf32> -> vector<16x96xf32>
    %17 = vector.broadcast %6 : vector<1x96xf32> to vector<16x96xf32>
    %18 = arith.addf %16, %17 : vector<16x96xf32>
    %19 = vector.extract_strided_slice %18 {offsets = [0, 0], sizes = [16, 8], strides = [1, 1]} : vector<16x96xf32> to vector<16x8xf32>
    %20 = vector.shape_cast %19 : vector<16x8xf32> to vector<2x8x8xf32>
    %21 = vector.extract_strided_slice %18 {offsets = [0, 8], sizes = [16, 8], strides = [1, 1]} : vector<16x96xf32> to vector<16x8xf32>
    %22 = vector.shape_cast %21 : vector<16x8xf32> to vector<2x8x8xf32>
    %23 = vector.extract_strided_slice %18 {offsets = [0, 16], sizes = [16, 8], strides = [1, 1]} : vector<16x96xf32> to vector<16x8xf32>
    %24 = vector.shape_cast %23 : vector<16x8xf32> to vector<2x8x8xf32>
    %25 = vector.extract_strided_slice %18 {offsets = [0, 24], sizes = [16, 8], strides = [1, 1]} : vector<16x96xf32> to vector<16x8xf32>
    %26 = vector.shape_cast %25 : vector<16x8xf32> to vector<2x8x8xf32>
    %27 = tpu.concatenate %20, %22, %24, %26 in 0 : vector<2x8x8xf32>, vector<2x8x8xf32>, vector<2x8x8xf32>, vector<2x8x8xf32> -> vector<8x8x8xf32>
    %28 = vector.extract_strided_slice %18 {offsets = [0, 32], sizes = [16, 8], strides = [1, 1]} : vector<16x96xf32> to vector<16x8xf32>
    %29 = vector.shape_cast %28 : vector<16x8xf32> to vector<2x8x8xf32>
    %30 = vector.extract_strided_slice %18 {offsets = [0, 40], sizes = [16, 8], strides = [1, 1]} : vector<16x96xf32> to vector<16x8xf32>
    %31 = vector.shape_cast %30 : vector<16x8xf32> to vector<2x8x8xf32>
    %32 = vector.extract_strided_slice %18 {offsets = [0, 48], sizes = [16, 8], strides = [1, 1]} : vector<16x96xf32> to vector<16x8xf32>
    %33 = vector.shape_cast %32 : vector<16x8xf32> to vector<2x8x8xf32>
    %34 = vector.extract_strided_slice %18 {offsets = [0, 56], sizes = [16, 8], strides = [1, 1]} : vector<16x96xf32> to vector<16x8xf32>
    %35 = vector.shape_cast %34 : vector<16x8xf32> to vector<2x8x8xf32>
    %36 = tpu.concatenate %29, %31, %33, %35 in 0 : vector<2x8x8xf32>, vector<2x8x8xf32>, vector<2x8x8xf32>, vector<2x8x8xf32> -> vector<8x8x8xf32>
    %37 = vector.extract_strided_slice %18 {offsets = [0, 64], sizes = [16, 8], strides = [1, 1]} : vector<16x96xf32> to vector<16x8xf32>
    %38 = vector.shape_cast %37 : vector<16x8xf32> to vector<2x8x8xf32>
    %39 = vector.extract_strided_slice %18 {offsets = [0, 72], sizes = [16, 8], strides = [1, 1]} : vector<16x96xf32> to vector<16x8xf32>
    %40 = vector.shape_cast %39 : vector<16x8xf32> to vector<2x8x8xf32>
    %41 = vector.extract_strided_slice %18 {offsets = [0, 80], sizes = [16, 8], strides = [1, 1]} : vector<16x96xf32> to vector<16x8xf32>
    %42 = vector.shape_cast %41 : vector<16x8xf32> to vector<2x8x8xf32>
    %43 = vector.extract_strided_slice %18 {offsets = [0, 88], sizes = [16, 8], strides = [1, 1]} : vector<16x96xf32> to vector<16x8xf32>
    %44 = vector.shape_cast %43 : vector<16x8xf32> to vector<2x8x8xf32>
    %45 = tpu.concatenate %38, %40, %42, %44 in 0 : vector<2x8x8xf32>, vector<2x8x8xf32>, vector<2x8x8xf32>, vector<2x8x8xf32> -> vector<8x8x8xf32>
    "tpu.trace_start"() <{level = 10 : i32, message = "gqd,gkd->gqk"}> : () -> ()
    %cst_6 = arith.constant dense<0.000000e+00> : vector<8x8x8xf32>
    %46 = tpu.matmul %27, %36, %cst_6 {dimension_numbers = #tpu.dot_dimension_numbers<[2], [2], [1], [1], [0, 0, 0, 1, 1, 1], [0], [0]>} : vector<8x8x8xf32>, vector<8x8x8xf32>, vector<8x8x8xf32> -> vector<8x8x8xf32>
    "tpu.trace_stop"() : () -> ()
    %cst_7 = arith.constant dense<0xFF800000> : vector<8x8xf32>
    %47 = vector.multi_reduction <maximumf>, %46, %cst_7 [2] : vector<8x8x8xf32> to vector<8x8xf32>
    %48 = vector.shape_cast %47 : vector<8x8xf32> to vector<8x8x1xf32>
    %49 = vector.broadcast %48 : vector<8x8x1xf32> to vector<8x8x8xf32>
    %50 = arith.subf %46, %49 : vector<8x8x8xf32>
    %51 = math.exp %50 : vector<8x8x8xf32>
    %cst_8 = arith.constant dense<0.000000e+00> : vector<8x8xf32>
    %52 = vector.multi_reduction <add>, %51, %cst_8 [2] : vector<8x8x8xf32> to vector<8x8xf32>
    %53 = vector.shape_cast %52 : vector<8x8xf32> to vector<8x8x1xf32>
    %54 = tpu.reciprocal %53 {approx = true} : vector<8x8x1xf32> -> vector<8x8x1xf32>
    %55 = vector.broadcast %54 : vector<8x8x1xf32> to vector<8x8x8xf32>
    %56 = arith.mulf %51, %55 : vector<8x8x8xf32>
    "tpu.trace_start"() <{level = 10 : i32, message = "gqk,gkd->gqd"}> : () -> ()
    %cst_9 = arith.constant dense<0.000000e+00> : vector<8x8x8xf32>
    %57 = tpu.matmul %56, %45, %cst_9 {dimension_numbers = #tpu.dot_dimension_numbers<[2], [1], [1], [2], [0, 0, 0, 1, 1, 2], [0], [0]>} : vector<8x8x8xf32>, vector<8x8x8xf32>, vector<8x8x8xf32> -> vector<8x8x8xf32>
    "tpu.trace_stop"() : () -> ()
    %58 = vector.extract_strided_slice %57 {offsets = [0, 0, 0], sizes = [2, 8, 8], strides = [1, 1, 1]} : vector<8x8x8xf32> to vector<2x8x8xf32>
    %59 = vector.extract_strided_slice %57 {offsets = [2, 0, 0], sizes = [2, 8, 8], strides = [1, 1, 1]} : vector<8x8x8xf32> to vector<2x8x8xf32>
    %60 = vector.extract_strided_slice %57 {offsets = [4, 0, 0], sizes = [2, 8, 8], strides = [1, 1, 1]} : vector<8x8x8xf32> to vector<2x8x8xf32>
    %61 = vector.extract_strided_slice %57 {offsets = [6, 0, 0], sizes = [2, 8, 8], strides = [1, 1, 1]} : vector<8x8x8xf32> to vector<2x8x8xf32>
    %62 = tpu.concatenate %58, %59, %60, %61 in 2 : vector<2x8x8xf32>, vector<2x8x8xf32>, vector<2x8x8xf32>, vector<2x8x8xf32> -> vector<2x8x32xf32>
    %63 = vector.shape_cast %62 : vector<2x8x32xf32> to vector<16x32xf32>
    %cst_10 = arith.constant dense<0.000000e+00> : vector<16x32xf32>
    %64 = tpu.matmul %63, %1, %cst_10 {dimension_numbers = #tpu.dot_dimension_numbers<[1], [0], [0], [1], [0, 0, 1, 1], [], []>} : vector<16x32xf32>, vector<32x32xf32>, vector<16x32xf32> -> vector<16x32xf32>
    %65 = vector.broadcast %7 : vector<1x32xf32> to vector<16x32xf32>
    %66 = arith.addf %64, %65 : vector<16x32xf32>
    %67 = arith.addf %15, %66 : vector<16x32xf32>
    %cst_11 = arith.constant dense<0.000000e+00> : vector<16xf32>
    %68 = vector.multi_reduction <add>, %67, %cst_11 [1] : vector<16x32xf32> to vector<16xf32>
    %69 = vector.shape_cast %68 : vector<16xf32> to vector<16x1xf32>
    %cst_12 = arith.constant 3.200000e+01 : f32
    %70 = vector.broadcast %cst_12 : f32 to vector<16x1xf32>
    %71 = arith.divf %69, %70 : vector<16x1xf32>
    %72 = vector.broadcast %71 : vector<16x1xf32> to vector<16x32xf32>
    %73 = arith.subf %67, %72 : vector<16x32xf32>
    %74 = arith.mulf %73, %73 : vector<16x32xf32>
    %cst_13 = arith.constant dense<0.000000e+00> : vector<16xf32>
    %75 = vector.multi_reduction <add>, %74, %cst_13 [1] : vector<16x32xf32> to vector<16xf32>
    %76 = vector.shape_cast %75 : vector<16xf32> to vector<16x1xf32>
    %cst_14 = arith.constant 3.200000e+01 : f32
    %77 = vector.broadcast %cst_14 : f32 to vector<16x1xf32>
    %78 = arith.divf %76, %77 : vector<16x1xf32>
    %79 = vector.broadcast %71 : vector<16x1xf32> to vector<16x32xf32>
    %80 = arith.subf %67, %79 : vector<16x32xf32>
    %cst_15 = arith.constant 9.99999974E-6 : f32
    %81 = vector.broadcast %cst_15 : f32 to vector<16x1xf32>
    %82 = arith.addf %78, %81 : vector<16x1xf32>
    %83 = math.rsqrt %82 : vector<16x1xf32>
    %84 = vector.broadcast %83 : vector<16x1xf32> to vector<16x32xf32>
    %85 = arith.mulf %80, %84 : vector<16x32xf32>
    %86 = vector.broadcast %8 : vector<1x32xf32> to vector<16x32xf32>
    %87 = arith.mulf %85, %86 : vector<16x32xf32>
    %88 = vector.broadcast %9 : vector<1x32xf32> to vector<16x32xf32>
    %89 = arith.addf %87, %88 : vector<16x32xf32>
    %cst_16 = arith.constant dense<0.000000e+00> : vector<16x4xf32>
    %90 = tpu.matmul %89, %3, %cst_16 {dimension_numbers = #tpu.dot_dimension_numbers<[1], [1], [0], [0], [0, 0, 1, 0], [], []>} : vector<16x32xf32>, vector<4x32xf32>, vector<16x4xf32> -> vector<16x4xf32>
    %91 = vector.broadcast %13 : vector<1x4xf32> to vector<16x4xf32>
    %92 = arith.addf %90, %91 : vector<16x4xf32>
    %cst_17 = arith.constant dense<0x7F800000> : vector<16xf32>
    %93 = vector.multi_reduction <minimumf>, %92, %cst_17 [1] : vector<16x4xf32> to vector<16xf32>
    %94 = vector.shape_cast %93 : vector<16xf32> to vector<16x1xf32>
    %cst_18 = arith.constant dense<0xFF800000> : vector<16xf32>
    %95 = vector.multi_reduction <maximumf>, %92, %cst_18 [1] : vector<16x4xf32> to vector<16xf32>
    %96 = vector.shape_cast %95 : vector<16xf32> to vector<16x1xf32>
    %97 = vector.broadcast %94 : vector<16x1xf32> to vector<16x4xf32>
    %98 = arith.subf %92, %97 : vector<16x4xf32>
    %99 = arith.subf %96, %94 : vector<16x1xf32>
    %cst_19 = arith.constant 9.99999993E-9 : f32
    %100 = vector.broadcast %cst_19 : f32 to vector<16x1xf32>
    %101 = arith.addf %99, %100 : vector<16x1xf32>
    %102 = tpu.reciprocal %101 {approx = true} : vector<16x1xf32> -> vector<16x1xf32>
    %103 = vector.broadcast %102 : vector<16x1xf32> to vector<16x4xf32>
    %104 = arith.mulf %98, %103 : vector<16x4xf32>
    %cst_20 = arith.constant 3.14159274 : f32
    %105 = vector.broadcast %cst_20 : f32 to vector<16x4xf32>
    %106 = arith.mulf %104, %105 : vector<16x4xf32>
    %107 = vector.broadcast %14 : vector<1x4xf32> to vector<16x4xf32>
    %108 = arith.addf %106, %107 : vector<16x4xf32>
    %109 = math.cos %108 : vector<16x4xf32>
    %110 = vector.extract_strided_slice %109 {offsets = [0, 0], sizes = [16, 1], strides = [1, 1]} : vector<16x4xf32> to vector<16x1xf32>
    %111 = vector.extract_strided_slice %109 {offsets = [0, 1], sizes = [16, 1], strides = [1, 1]} : vector<16x4xf32> to vector<16x1xf32>
    %112 = vector.extract_strided_slice %109 {offsets = [0, 2], sizes = [16, 1], strides = [1, 1]} : vector<16x4xf32> to vector<16x1xf32>
    %113 = vector.extract_strided_slice %109 {offsets = [0, 3], sizes = [16, 1], strides = [1, 1]} : vector<16x4xf32> to vector<16x1xf32>
    %114 = arith.mulf %110, %111 : vector<16x1xf32>
    %115 = arith.mulf %114, %112 : vector<16x1xf32>
    %116 = arith.mulf %115, %113 : vector<16x1xf32>
    %117 = arith.mulf %111, %112 : vector<16x1xf32>
    %118 = arith.mulf %117, %113 : vector<16x1xf32>
    %119 = tpu.concatenate %118, %114, %115, %116 in 1 : vector<16x1xf32>, vector<16x1xf32>, vector<16x1xf32>, vector<16x1xf32> -> vector<16x4xf32>
    %cst_21 = arith.constant dense<0.000000e+00> : vector<16x32xf32>
    %120 = tpu.matmul %119, %4, %cst_21 {dimension_numbers = #tpu.dot_dimension_numbers<[1], [0], [0], [1], [0, 0, 1, 1], [], []>} : vector<16x4xf32>, vector<4x32xf32>, vector<16x32xf32> -> vector<16x32xf32>
    %121 = vector.broadcast %10 : vector<1x32xf32> to vector<16x32xf32>
    %122 = arith.addf %120, %121 : vector<16x32xf32>
    %123 = arith.addf %89, %122 : vector<16x32xf32>
    %cst_22 = arith.constant dense<0.000000e+00> : vector<16xf32>
    %124 = vector.multi_reduction <add>, %123, %cst_22 [1] : vector<16x32xf32> to vector<16xf32>
    %125 = vector.shape_cast %124 : vector<16xf32> to vector<16x1xf32>
    %cst_23 = arith.constant 3.200000e+01 : f32
    %126 = vector.broadcast %cst_23 : f32 to vector<16x1xf32>
    %127 = arith.divf %125, %126 : vector<16x1xf32>
    %128 = vector.broadcast %127 : vector<16x1xf32> to vector<16x32xf32>
    %129 = arith.subf %123, %128 : vector<16x32xf32>
    %130 = arith.mulf %129, %129 : vector<16x32xf32>
    %cst_24 = arith.constant dense<0.000000e+00> : vector<16xf32>
    %131 = vector.multi_reduction <add>, %130, %cst_24 [1] : vector<16x32xf32> to vector<16xf32>
    %132 = vector.shape_cast %131 : vector<16xf32> to vector<16x1xf32>
    %cst_25 = arith.constant 3.200000e+01 : f32
    %133 = vector.broadcast %cst_25 : f32 to vector<16x1xf32>
    %134 = arith.divf %132, %133 : vector<16x1xf32>
    %135 = vector.broadcast %127 : vector<16x1xf32> to vector<16x32xf32>
    %136 = arith.subf %123, %135 : vector<16x32xf32>
    %cst_26 = arith.constant 9.99999974E-6 : f32
    %137 = vector.broadcast %cst_26 : f32 to vector<16x1xf32>
    %138 = arith.addf %134, %137 : vector<16x1xf32>
    %139 = math.rsqrt %138 : vector<16x1xf32>
    %140 = vector.broadcast %139 : vector<16x1xf32> to vector<16x32xf32>
    %141 = arith.mulf %136, %140 : vector<16x32xf32>
    %142 = vector.broadcast %11 : vector<1x32xf32> to vector<16x32xf32>
    %143 = arith.mulf %141, %142 : vector<16x32xf32>
    %144 = vector.broadcast %12 : vector<1x32xf32> to vector<16x32xf32>
    %145 = arith.addf %143, %144 : vector<16x32xf32>
    %c0_27 = arith.constant 0 : index
    %c0_28 = arith.constant 0 : index
    %146 = vector.load %arg3[%c0_27, %c0_28] : memref<16x32xf32, #tpu.memory_space<vmem>>, vector<16x32xf32>
    tpu.vector_store %arg3[%c0_27, %c0_28], %145 {strides = array<i32>} : memref<16x32xf32, #tpu.memory_space<vmem>>, vector<16x32xf32>,
    return
  }
  func.func @transform_0(%arg0: i32) -> (i32, i32) {
    %c0_i32 = arith.constant 0 : i32
    %c0_i32_0 = arith.constant 0 : i32
    return %arg0, %c0_i32 : i32, i32
  }
  func.func @transform_1(%arg0: i32) -> (i32, i32) {
    %c0_i32 = arith.constant 0 : i32
    %c0_i32_0 = arith.constant 0 : i32
    %c0_i32_1 = arith.constant 0 : i32
    return %c0_i32, %c0_i32_0 : i32, i32
  }
  func.func @transform_2(%arg0: i32) -> (i32, i32) {
    %c0_i32 = arith.constant 0 : i32
    %c0_i32_0 = arith.constant 0 : i32
    return %arg0, %c0_i32 : i32, i32
  }
}

</mosaic_0001>

<bundles_post_ra>
// kernel: quantum_encoder_layer.1
= control target key start
LH: loop header
LB: loop body
LE: loop exit
PB: predicated region body
PF: predicated region fallthrough
CT: control target
= control target key end

     0   :  { %vm28_vm0 = vcmask 261120   ;;  %s2848_s0 = inlined_call_operand.vmem [shape: f32[16,32], index: 0, kind: input, shape index: {}]   ;;  %s2849_s1 = inlined_call_operand.vmem [shape: f32[80,96], index: 1, kind: input, shape index: {}]   ;;  %s2850_s2 = inlined_call_operand.hbm [shape: f32[16,32], index: 2, kind: output, shape index: {}]  }
   0x1   :  { %v12_v0 = vld [vmem:[%s2849_s1] sm:$0xff]  ;;  %v13_v1 = vld [vmem:[%s2849_s1 + $0x8] sm:$0xff]  ;;  %v14_v2 = vld [vmem:[%s2849_s1 + $0x10] sm:$0xff] }
   0x2   :  { %v2328_v3 = vpack.c.bf16 %v13_v1, %v12_v0  ;;  %v15_v4 = vld [vmem:[%s2849_s1 + $0x18] sm:$0xff]  ;;  %v2509_v5 = vld [vmem:[%s2848_s0] sm:$0xff] }
   0x3   :  { %v2332_v6 = vpack.c.bf16 %v15_v4, %v14_v2  ;;  %2224 = vmatprep.mubr.msk.f32.mxu0 %vm28_vm0, %v2509_v5 }
   0x4   :  { %7 = vsyncpa [#allocation3], 0  ;;  %2329 = vmatprep.subr.bf16.mxu0 %v2328_v3  ;;  %v2516_v7 = vld [vmem:[%s2848_s0 + $0x8] sm:$0xff]  ;;  %v24_v8 = vlaneseq  ;;  %v2454_v14 = vmov 0.0   ;;  %s2455_s0 = smov 112   ;;  %s2456_s23 = smov 120  }
   0x5   :  { %2331 = vmatpush3.bf16.msra.mxu0 %v2328_v3  ;;  %v2526_v11 = vld [vmem:[%s2849_s1 + $0x48] sm:$0xff]  ;;  %2227 = vmatprep.subr.mxu1 %v2454_v14  ;;  %vm2457_vm1 = vmmov 0   ;;  %s2458_s24 = smov 104   ;;  %s2459_s25 = smov 96   ;;  %vm126_vm2 = vcmask 64512   ;;  %vm1455_vm3 = vcmask 130048  }
   0x6   :  { %2333 = vmatprep.subr.bf16.mxu0 %v2332_v6  ;;  %v2520_v9 = vshrl.u32 %v24_v8, 7  ;;  %2229 = vmatprep.mubr.msk.f32.mxu1 %vm2457_vm1, %v2454_v14  ;;  %s2460_s26 = smov 64   ;;  %s2461_s7 = smov 8   ;;  %vm1458_vm4 = vcmask 195584   ;;  %vm1675_vm5 = vcmask 31744  }
   0x7   :  { %s2462_s8 = smov 16   ;;  %s2463_s9 = smov 24  }
   0x8   :  { %v26_v10 = vsub.s32 0, %v2520_v9  ;;  %s2464_s12 = smov 124   ;;  %s2471_s13 = smov 127  }
   0x9   :  { %2335 = vmatpush3.bf16.msra.mxu0 %v2332_v6  ;;  %s2472_s14 = smov 126   ;;  %s2473_s15 = smov 125  }
   0xa   :  { %v27_v12 = vrot.slane %v2526_v11, %v26_v10  ;;  %2237 = vmatprep.subr.mxu0 %v2454_v14  ;;  %s2474_s16 = smov 1   ;;  %s2475_s17 = smov 2  }
   0xb   :  { %s2476_s18 = smov 3  }
   0xc   :  { %2225 = vmatmul.mubr.msk.f32.vlgmr.msra.gmra.mrb[0].mxu0 %vm28_vm0, %v2516_v7 }
   0xd   :  { %2239 = vmatprep.mubr.msk.f32.mxu0 %vm2457_vm1, %v2454_v14 }
  0xdf   :  { %v2226_v13 = vpop.f32.mrb[0].mxu0 }
  0xe0   :  { %v101_v15 = vpop.f32.mrb[1].mxu0  ;;  %v2539_v17 = vadd.f32 %v2226_v13, %v27_v12 }
  0xe1   :  { %v2531_v16 = vadd.f32 %v101_v15, %v27_v12 }
  0xe3   :  { %116 = vrot.lane.b32.xlu1 %v2531_v16, %s2455_s0  ;;  %112 = vrot.lane.b32.xlu0 %v2531_v16, %s2456_s23 }
  0xe7   :  { %118 = vrot.lane.b32.xlu1 %v2539_v17, %s2455_s0  ;;  %114 = vrot.lane.b32.xlu0 %v2539_v17, %s2456_s23 }
  0xeb   :  { %122 = vrot.lane.b32.xlu1 %v2539_v17, %s2458_s24  ;;  %120 = vrot.lane.b32.xlu0 %v2531_v16, %s2458_s24 }
  0xef   :  { %201 = vrot.lane.b32.xlu1 %v2539_v17, %s2459_s25  ;;  %124 = vrot.lane.b32.xlu0 %v2531_v16, %s2459_s25 }
 0x155   :  { %v2547_v18 = vpop.permute.xlu1 %116  ;;  %v2549_v19 = vpop.permute.xlu0 %112 }
 0x156   :  { %277 = vrot.lane.b32.xlu0 %v2549_v19, %s2459_s25 }
 0x159   :  { %v2552_v20 = vpop.permute.xlu1 %118  ;;  %v2554_v21 = vpop.permute.xlu0 %114 }
 0x15a   :  { %429 = vrot.lane.b32.xlu0 %v2547_v18, %s2459_s25  ;;  %353 = vrot.lane.b32.xlu1 %v2554_v21, %s2459_s25 }
 0x15d   :  { %v2558_v22 = vpop.permute.xlu0 %120  ;;  %v2562_v23 = vpop.permute.xlu1 %122 }
 0x15e   :  { %505 = vrot.lane.b32.xlu1 %v2552_v20, %s2459_s25  ;;  %581 = vrot.lane.b32.xlu0 %v2558_v22, %s2459_s25 }
 0x161   :  { %v125_v24 = vpop.permute.xlu0 %124  ;;  %v202_v25 = vpop.permute.xlu1 %201 }
 0x162   :  { %657 = vrot.lane.b32.xlu1 %v2562_v23, %s2459_s25  ;;  %2228 = vmatpush3.xpose.msk.msra.mxu1 %vm126_vm2, %v125_v24 }
 0x163   :  { %2232 = vmatprep.subr.mxu1 %v2454_v14 }
 0x165   :  { %2230 = vmatmul.mubr.msk.f32.vlgmr.msra.gmra.mrb[0].mxu1 %vm126_vm2, %v2531_v16 }
 0x166   :  { %2233 = vmatpush3.xpose.msk.msra.mxu1 %vm126_vm2, %v202_v25  ;;  %2234 = vmatprep.mubr.msk.f32.mxu1 %vm2457_vm1, %v2454_v14 }
 0x167   :  { %2242 = vmatprep.subr.mxu1 %v2454_v14 }
 0x169   :  { %2235 = vmatmul.mubr.msk.f32.vlgmr.msra.gmra.mrb[2].mxu1 %vm126_vm2, %v2539_v17 }
 0x16a   :  { %2244 = vmatprep.mubr.msk.f32.mxu1 %vm2457_vm1, %v2454_v14 }
 0x1c8   :  { %v278_v26 = vpop.permute.xlu0 %277 }
 0x1c9   :  { %2238 = vmatpush3.xpose.msk.msra.mxu0 %vm126_vm2, %v278_v26 }
 0x1ca   :  { %2247 = vmatprep.subr.mxu0 %v2454_v14 }
 0x1cc   :  { %v354_v27 = vpop.permute.xlu1 %353  ;;  %2240 = vmatmul.mubr.msk.f32.vlgmr.msra.gmra.mrb[2].mxu0 %vm126_vm2, %v2549_v19  ;;  %v430_v28 = vpop.permute.xlu0 %429 }
 0x1cd   :  { %2243 = vmatpush3.xpose.msk.msra.mxu1 %vm126_vm2, %v354_v27  ;;  %2248 = vmatpush3.xpose.msk.msra.mxu0 %vm126_vm2, %v430_v28 }
 0x1ce   :  { %2249 = vmatprep.mubr.msk.f32.mxu0 %vm2457_vm1, %v2454_v14  ;;  %2252 = vmatprep.subr.mxu1 %v2454_v14 }
 0x1cf   :  { %2257 = vmatprep.subr.mxu0 %v2454_v14 }
 0x1d0   :  { %v506_v29 = vpop.permute.xlu1 %505  ;;  %2245 = vmatmul.mubr.msk.f32.vlgmr.msra.gmra.mrb[4].mxu1 %vm126_vm2, %v2554_v21  ;;  %2250 = vmatmul.mubr.msk.f32.vlgmr.msra.gmra.mrb[4].mxu0 %vm126_vm2, %v2547_v18  ;;  %v582_v30 = vpop.permute.xlu0 %581 }
 0x1d1   :  { %2253 = vmatpush3.xpose.msk.msra.mxu1 %vm126_vm2, %v506_v29  ;;  %2258 = vmatpush3.xpose.msk.msra.mxu0 %vm126_vm2, %v582_v30 }
 0x1d2   :  { %2254 = vmatprep.mubr.msk.f32.mxu1 %vm2457_vm1, %v2454_v14  ;;  %2259 = vmatprep.mubr.msk.f32.mxu0 %vm2457_vm1, %v2454_v14 }
 0x1d3   :  { %2262 = vmatprep.subr.mxu1 %v2454_v14  ;;  %2267 = vmatprep.subr.mxu0 %v2454_v14 }
 0x1d4   :  { %v658_v31 = vpop.permute.xlu1 %657  ;;  %2255 = vmatmul.mubr.msk.f32.vlgmr.msra.gmra.mrb[6].mxu1 %vm126_vm2, %v2552_v20  ;;  %2260 = vmatmul.mubr.msk.f32.vlgmr.msra.gmra.mrb[6].mxu0 %vm126_vm2, %v2558_v22 }
 0x1d5   :  { %2263 = vmatpush3.xpose.msk.msra.mxu1 %vm126_vm2, %v658_v31  ;;  %2264 = vmatprep.mubr.msk.f32.mxu1 %vm2457_vm1, %v2454_v14 }
 0x1d6   :  { %2272 = vmatprep.subr.mxu1 %v2454_v14  ;;  %2269 = vmatprep.mubr.msk.f32.mxu0 %vm2457_vm1, %v2454_v14 }
 0x1d8   :  { %2265 = vmatmul.mubr.msk.f32.vlgmr.msra.gmra.mrb[8].mxu1 %vm126_vm2, %v2562_v23 }
 0x1d9   :  { %2274 = vmatprep.mubr.msk.f32.mxu1 %vm2457_vm1, %v2454_v14 }
 0x238   :  { %v197_v32 = vpop.f32.mrb[0].mxu1 }
 0x239   :  { %v2231_v33 = vpop.f32.mrb[1].mxu1  ;;  %v733_v34 = vsel %vm126_vm2, %v197_v32, -inf }
 0x23a   :  { %734 = vmax.xlane.f32.xlu0 %v733_v34 }
 0x23c   :  { %v273_v35 = vpop.f32.mrb[2].mxu1 }
 0x23d   :  { %v2236_v36 = vpop.f32.mrb[3].mxu1  ;;  %v736_v37 = vsel %vm126_vm2, %v273_v35, -inf }
 0x23e   :  { %737 = vmax.xlane.f32.xlu1 %v736_v37 }
 0x29f   :  { %v349_v38 = vpop.f32.mrb[2].mxu0 }
 0x2a0   :  { %v2241_v39 = vpop.f32.mrb[3].mxu0  ;;  %v739_v40 = vsel %vm126_vm2, %v349_v38, -inf }
 0x2a1   :  { %740 = vmax.xlane.f32.xlu0 %v739_v40 }
 0x2a3   :  { %v425_v41 = vpop.f32.mrb[4].mxu1  ;;  %v501_v42 = vpop.f32.mrb[4].mxu0 }
 0x2a4   :  { %v2246_v43 = vpop.f32.mrb[5].mxu1  ;;  %v2251_v44 = vpop.f32.mrb[5].mxu0  ;;  %v742_v45 = vsel %vm126_vm2, %v425_v41, -inf  ;;  %v745_v46 = vsel %vm126_vm2, %v501_v42, -inf }
 0x2a5   :  { %743 = vmax.xlane.f32.xlu0 %v742_v45  ;;  %746 = vmax.xlane.f32.xlu1 %v745_v46 }
 0x2a7   :  { %v577_v47 = vpop.f32.mrb[6].mxu1  ;;  %v653_v48 = vpop.f32.mrb[6].mxu0 }
 0x2a8   :  { %v2256_v49 = vpop.f32.mrb[7].mxu1  ;;  %v2261_v50 = vpop.f32.mrb[7].mxu0  ;;  %v748_v51 = vsel %vm126_vm2, %v577_v47, -inf  ;;  %v751_v52 = vsel %vm126_vm2, %v653_v48, -inf }
 0x2a9   :  { %749 = vmax.xlane.f32.xlu0 %v748_v51  ;;  %752 = vmax.xlane.f32.xlu1 %v751_v52 }
 0x2ab   :  { %v729_v53 = vpop.f32.mrb[8].mxu1 }
 0x2ac   :  { %v2266_v54 = vpop.f32.mrb[9].mxu1  ;;  %v754_v55 = vsel %vm126_vm2, %v729_v53, -inf }
 0x2ad   :  { %755 = vmax.xlane.f32.xlu0 %v754_v55 }
 0x2ba   :  { %821 = vrot.lane.b32.xlu1 %v2531_v16, %s2460_s26 }
 0x2be   :  { %973 = vrot.lane.b32.xlu1 %v2549_v19, %s2460_s26 }
 0x2c2   :  { %1049 = vrot.lane.b32.xlu1 %v2554_v21, %s2460_s26 }
 0x2c3   :  { %897 = vrot.lane.b32.xlu0 %v2539_v17, %s2460_s26 }
 0x2c6   :  { %1201 = vrot.lane.b32.xlu1 %v2552_v20, %s2460_s26 }
 0x2c7   :  { %1125 = vrot.lane.b32.xlu0 %v2547_v18, %s2460_s26  ;;  %v735_v58 = vpop.xlane.xlu0 %734 }
 0x2c8   :  { %v757_v59 = vsub.f32 %v197_v32, %v735_v58 }
 0x2ca   :  { %v765_v61 = vmul.f32 1.442695, %v757_v59 }
 0x2cb   :  { %v738_v56 = vpop.xlane.xlu1 %737 }
 0x2cc   :  { %v758_v57 = vsub.f32 %v273_v35, %v738_v56 }
 0x2ce   :  { %v767_v60 = vmul.f32 1.442695, %v758_v57 }
 0x2d0   :  { %2377 = vpow2.f32 %v767_v60 }
 0x2d1   :  { %2379 = vpow2.f32 %v765_v61 }
 0x2da   :  { %v2633_v62 = vpop.eup %2377 }
 0x2db   :  { %v784_v63 = vsel %vm126_vm2, %v2633_v62, 0.0  ;;  %v2637_v0 = vpop.eup %2379 }
 0x2dc   :  { %v781_v1 = vsel %vm126_vm2, %v2637_v0, 0.0 }
 0x2e6   :  { %785 = vadd.xlane.f32.xlu0 %v784_v63 }
 0x2ea   :  { %782 = vadd.xlane.f32.xlu1 %v781_v1 }
 0x32e   :  { %v741_v2 = vpop.xlane.xlu0 %740 }
 0x32f   :  { %v759_v3 = vsub.f32 %v349_v38, %v741_v2 }
 0x331   :  { %v769_v4 = vmul.f32 1.442695, %v759_v3 }
 0x332   :  { %v747_v6 = vpop.xlane.xlu1 %746  ;;  %v744_v8 = vpop.xlane.xlu0 %743 }
 0x333   :  { %2381 = vpow2.f32 %v769_v4  ;;  %v761_v10 = vsub.f32 %v501_v42, %v747_v6  ;;  %v760_v12 = vsub.f32 %v425_v41, %v744_v8 }
 0x335   :  { %v773_v13 = vmul.f32 1.442695, %v761_v10  ;;  %v771_v15 = vmul.f32 1.442695, %v760_v12 }
 0x336   :  { %v753_v16 = vpop.xlane.xlu1 %752  ;;  %v750_v17 = vpop.xlane.xlu0 %749 }
 0x337   :  { %2383 = vpow2.f32 %v773_v13  ;;  %v763_v18 = vsub.f32 %v653_v48, %v753_v16  ;;  %v762_v19 = vsub.f32 %v577_v47, %v750_v17  ;;  %v16_v13 = vld [vmem:[%s2849_s1 + $0x20] sm:$0xff]  ;;  %v19_v17 = vld [vmem:[%s2849_s1 + $0x38] sm:$0xff] }
 0x338   :  { %2385 = vpow2.f32 %v771_v15  ;;  %v17_v15 = vld [vmem:[%s2849_s1 + $0x28] sm:$0xff] }
 0x339   :  { %v777_v20 = vmul.f32 1.442695, %v763_v18  ;;  %v775_v21 = vmul.f32 1.442695, %v762_v19  ;;  %v2336_v16 = vpack.c.bf16 %v17_v15, %v16_v13 }
 0x33a   :  { %v822_v24 = vpop.permute.xlu1 %821  ;;  %v756_v25 = vpop.xlane.xlu0 %755 }
 0x33b   :  { %2387 = vpow2.f32 %v777_v20  ;;  %v764_v26 = vsub.f32 %v729_v53, %v756_v25  ;;  %2268 = vmatpush3.msra.mxu0 %v822_v24 }
 0x33c   :  { %2389 = vpow2.f32 %v775_v21  ;;  %2277 = vmatprep.subr.mxu0 %v2454_v14 }
 0x33d   :  { %v2382_v27 = vpop.eup %2381  ;;  %v779_v28 = vmul.f32 1.442695, %v764_v26 }
 0x33e   :  { %v898_v29 = vpop.permute.xlu0 %897  ;;  %v787_v30 = vsel %vm126_vm2, %v2382_v27, 0.0  ;;  %v974_v41 = vpop.permute.xlu1 %973 }
 0x33f   :  { %2391 = vpow2.f32 %v779_v28  ;;  %788 = vadd.xlane.f32.xlu1 %v787_v30  ;;  %2273 = vmatpush3.msra.mxu1 %v898_v29 }
 0x340   :  { %2282 = vmatprep.subr.mxu1 %v2454_v14 }
 0x341   :  { %v2384_v31 = vpop.eup %2383 }
 0x342   :  { %v2386_v32 = vpop.eup %2385  ;;  %v793_v33 = vsel %vm126_vm2, %v2384_v31, 0.0  ;;  %v1050_v42 = vpop.permute.xlu1 %1049 }
 0x343   :  { %794 = vadd.xlane.f32.xlu1 %v793_v33  ;;  %v790_v34 = vsel %vm126_vm2, %v2386_v32, 0.0  ;;  %v1126_v43 = vpop.permute.xlu0 %1125 }
 0x344   :  { %791 = vadd.xlane.f32.xlu0 %v790_v34 }
 0x345   :  { %v2388_v35 = vpop.eup %2387 }
 0x346   :  { %v2390_v36 = vpop.eup %2389  ;;  %v799_v37 = vsel %vm126_vm2, %v2388_v35, 0.0  ;;  %v1202_v44 = vpop.permute.xlu1 %1201 }
 0x347   :  { %800 = vadd.xlane.f32.xlu1 %v799_v37  ;;  %v796_v38 = vsel %vm126_vm2, %v2390_v36, 0.0 }
 0x348   :  { %797 = vadd.xlane.f32.xlu0 %v796_v38 }
 0x349   :  { %v2648_v39 = vpop.eup %2391 }
 0x34a   :  { %v802_v40 = vsel %vm126_vm2, %v2648_v39, 0.0 }
 0x34c   :  { %803 = vadd.xlane.f32.xlu0 %v802_v40 }
 0x358   :  { %1353 = vrot.lane.b32.xlu1 %v2562_v23, %s2460_s26 }
 0x362   :  { %1277 = vrot.lane.b32.xlu0 %v2558_v22, %s2460_s26 }
 0x373   :  { %v786_v45 = vpop.xlane.xlu0 %785 }
 0x374   :  { %2393 = vrcp.f32 %v786_v45  ;;  %v1463_v45 = vsub.s32 1, %v2520_v9 }
 0x377   :  { %v783_v46 = vpop.xlane.xlu1 %782 }
 0x378   :  { %2395 = vrcp.f32 %v783_v46  ;;  %v1464_v46 = vrot.slane %v2526_v11, %v1463_v45 }
 0x37e   :  { %v2394_v47 = vpop.eup %2393 }
 0x37f   :  { %v814_v48 = vmul.f32 %v2394_v47, %v2633_v62 }
 0x381   :  { %2275 = vmatmul.mubr.msk.f32.vlgmr.msra.gmra.mrb[10].mxu1 %vm126_vm2, %v814_v48 }
 0x382   :  { %v2396_v49 = vpop.eup %2395  ;;  %2283 = vmatpush3.msra.mxu1 %v1050_v42  ;;  %2284 = vmatprep.mubr.msk.f32.mxu1 %vm2457_vm1, %v2454_v14 }
 0x383   :  { %v813_v22 = vmul.f32 %v2396_v49, %v2637_v0  ;;  %2292 = vmatprep.subr.mxu1 %v2454_v14 }
 0x385   :  { %2270 = vmatmul.mubr.msk.f32.vlgmr.msra.gmra.mrb[8].mxu0 %vm126_vm2, %v813_v22 }
 0x386   :  { %2278 = vmatpush3.msra.mxu0 %v974_v41  ;;  %2279 = vmatprep.mubr.msk.f32.mxu0 %vm2457_vm1, %v2454_v14 }
 0x387   :  { %2287 = vmatprep.subr.mxu0 %v2454_v14 }
 0x3cc   :  { %v789_v23 = vpop.xlane.xlu1 %788 }
 0x3cd   :  { %2397 = vrcp.f32 %v789_v23 }
 0x3d0   :  { %v795_v50 = vpop.xlane.xlu1 %794 }
 0x3d1   :  { %2399 = vrcp.f32 %v795_v50  ;;  %v792_v51 = vpop.xlane.xlu0 %791 }
 0x3d2   :  { %2401 = vrcp.f32 %v792_v51 }
 0x3d4   :  { %v801_v52 = vpop.xlane.xlu1 %800 }
 0x3d5   :  { %2403 = vrcp.f32 %v801_v52  ;;  %v798_v53 = vpop.xlane.xlu0 %797 }
 0x3d6   :  { %2405 = vrcp.f32 %v798_v53 }
 0x3d7   :  { %v2398_v54 = vpop.eup %2397 }
 0x3d8   :  { %v815_v55 = vmul.f32 %v2398_v54, %v2382_v27  ;;  %v1354_v2 = vpop.permute.xlu1 %1353 }
 0x3d9   :  { %v804_v56 = vpop.xlane.xlu0 %803 }
 0x3da   :  { %2407 = vrcp.f32 %v804_v56  ;;  %2280 = vmatmul.mubr.msk.f32.vlgmr.msra.gmra.mrb[10].mxu0 %vm126_vm2, %v815_v55 }
 0x3db   :  { %v2400_v57 = vpop.eup %2399  ;;  %2288 = vmatpush3.msra.mxu0 %v1126_v43  ;;  %2289 = vmatprep.mubr.msk.f32.mxu0 %vm2457_vm1, %v2454_v14 }
 0x3dc   :  { %v2402_v58 = vpop.eup %2401  ;;  %v817_v59 = vmul.f32 %v2400_v57, %v2384_v31  ;;  %2297 = vmatprep.subr.mxu0 %v2454_v14 }
 0x3dd   :  { %v816_v60 = vmul.f32 %v2402_v58, %v2386_v32  ;;  %v1278_v61 = vpop.permute.xlu0 %1277 }
 0x3de   :  { %2290 = vmatmul.mubr.msk.f32.vlgmr.msra.gmra.mrb[12].mxu0 %vm126_vm2, %v817_v59 }
 0x3df   :  { %v2404_v62 = vpop.eup %2403  ;;  %2285 = vmatmul.mubr.msk.f32.vlgmr.msra.gmra.mrb[12].mxu1 %vm126_vm2, %v816_v60  ;;  %2298 = vmatpush3.msra.mxu0 %v1278_v61 }
 0x3e0   :  { %v2406_v63 = vpop.eup %2405  ;;  %v819_v0 = vmul.f32 %v2404_v62, %v2388_v35  ;;  %2293 = vmatpush3.msra.mxu1 %v1202_v44  ;;  %2294 = vmatprep.mubr.msk.f32.mxu1 %vm2457_vm1, %v2454_v14 }
 0x3e1   :  { %v818_v1 = vmul.f32 %v2406_v63, %v2390_v36  ;;  %2299 = vmatprep.mubr.msk.f32.mxu0 %vm2457_vm1, %v2454_v14  ;;  %2302 = vmatprep.subr.mxu1 %v2454_v14 }
 0x3e2   :  { %2300 = vmatmul.mubr.msk.f32.vlgmr.msra.gmra.mrb[14].mxu0 %vm126_vm2, %v819_v0  ;;  %2337 = vmatprep.subr.bf16.mxu0 %v2336_v16 }
 0x3e3   :  { %2295 = vmatmul.mubr.msk.f32.vlgmr.msra.gmra.mrb[14].mxu1 %vm126_vm2, %v818_v1  ;;  %2339 = vmatpush3.bf16.msra.mxu0 %v2336_v16 }
 0x3e4   :  { %v2408_v3 = vpop.eup %2407  ;;  %2303 = vmatpush3.msra.mxu1 %v1354_v2  ;;  %2304 = vmatprep.mubr.msk.f32.mxu1 %vm2457_vm1, %v2454_v14  ;;  %v18_v14 = vld [vmem:[%s2849_s1 + $0x30] sm:$0xff] }
 0x3e5   :  { %v820_v4 = vmul.f32 %v2408_v3, %v2648_v39  ;;  %v2340_v18 = vpack.c.bf16 %v19_v17, %v18_v14 }
 0x3e7   :  { %2305 = vmatmul.mubr.msk.f32.vlgmr.msra.gmra.mrb[16].mxu1 %vm126_vm2, %v820_v4  ;;  %2341 = vmatprep.subr.bf16.mxu0 %v2340_v18  ;;  %v1577_v4 = vsub.s32 2, %v2520_v9 }
 0x3e8   :  { %2343 = vmatpush3.bf16.msra.mxu0 %v2340_v18 }
 0x454   :  { %v969_v6 = vpop.f32.mrb[10].mxu1 }
 0x455   :  { %v2276_v8 = vpop.f32.mrb[11].mxu1 }
 0x456   :  { %v1578_v8 = vrot.slane %v2526_v11, %v1577_v4 }
 0x458   :  { %v893_v10 = vpop.f32.mrb[8].mxu0 }
 0x459   :  { %v2271_v12 = vpop.f32.mrb[9].mxu0 }
 0x4ad   :  { %v1045_v19 = vpop.f32.mrb[10].mxu0 }
 0x4ae   :  { %v2281_v20 = vpop.f32.mrb[11].mxu0  ;;  %1431 = vrot.lane.b32.xlu0 %v1045_v19, %s2461_s7 }
 0x4af   :  { %v1589_v20 = vsub.s32 7, %v2520_v9 }
 0x4b1   :  { %v1197_v21 = vpop.f32.mrb[12].mxu0 }
 0x4b2   :  { %v1121_v24 = vpop.f32.mrb[12].mxu1  ;;  %1439 = vrot.lane.b32.xlu0 %v1197_v21, %s2462_s8  ;;  %v2291_v25 = vpop.f32.mrb[13].mxu0  ;;  %v1590_v21 = vrot.slane %v2526_v11, %v1589_v20 }
 0x4b3   :  { %1433 = vrot.lane.b32.xlu1 %v1121_v24, %s2461_s7  ;;  %v2286_v26 = vpop.f32.mrb[13].mxu1 }
 0x4b5   :  { %v1349_v27 = vpop.f32.mrb[14].mxu0 }
 0x4b6   :  { %v1273_v28 = vpop.f32.mrb[14].mxu1  ;;  %1447 = vrot.lane.b32.xlu0 %v1349_v27, %s2463_s9  ;;  %v2301_v29 = vpop.f32.mrb[15].mxu0 }
 0x4b7   :  { %1441 = vrot.lane.b32.xlu1 %v1273_v28, %s2462_s8  ;;  %v2296_v30 = vpop.f32.mrb[15].mxu1 }
 0x4ba   :  { %v1425_v31 = vpop.f32.mrb[16].mxu1 }
 0x4bb   :  { %1449 = vrot.lane.b32.xlu1 %v1425_v31, %s2463_s9  ;;  %v2306_v32 = vpop.f32.mrb[17].mxu1 }
 0x520   :  { %v1432_v33 = vpop.permute.xlu0 %1431 }
 0x521   :  { %v1453_v36 = vsel %vm126_vm2, %v893_v10, %v1432_v33 }
 0x524   :  { %v1440_v34 = vpop.permute.xlu0 %1439 }
 0x525   :  { %v1434_v35 = vpop.permute.xlu1 %1433  ;;  %v1456_v37 = vsel %vm1455_vm3, %v1453_v36, %v1440_v34 }
 0x526   :  { %v1454_v41 = vsel %vm126_vm2, %v969_v6, %v1434_v35  ;;  %v1583_v6 = vsub.s32 3, %v2520_v9 }
 0x528   :  { %v1448_v38 = vpop.permute.xlu0 %1447  ;;  %v1584_v13 = vrot.slane %v2526_v11, %v1583_v6 }
 0x529   :  { %v1442_v39 = vpop.permute.xlu1 %1441  ;;  %v1459_v40 = vsel %vm1458_vm4, %v1456_v37, %v1448_v38 }
 0x52a   :  { %2315 = vmatprep.mubr.msk.f32.mxu0 %vm28_vm0, %v1459_v40  ;;  %v1457_v42 = vsel %vm1455_vm3, %v1454_v41, %v1442_v39 }
 0x52d   :  { %v1450_v43 = vpop.permute.xlu1 %1449 }
 0x52e   :  { %v1460_v44 = vsel %vm1458_vm4, %v1457_v42, %v1450_v43 }
 0x52f   :  { %2316 = vmatmul.mubr.msk.f32.vlgmr.msra.gmra.mrb[16].mxu0 %vm28_vm0, %v1460_v44 }
 0x602   :  { %v2317_v47 = vpop.f32.mrb[16].mxu0 }
 0x603   :  { %v1543_v48 = vadd.f32 %v2317_v47, %v1464_v46  ;;  %v1537_v49 = vpop.f32.mrb[17].mxu0 }
 0x604   :  { %v1538_v22 = vadd.f32 %v1537_v49, %v1464_v46 }
 0x605   :  { %v1547_v23 = vadd.f32 %v1543_v48, %v2516_v7 }
 0x606   :  { %v1546_v50 = vadd.f32 %v1538_v22, %v2509_v5  ;;  %v2712_v5 = vld [vmem:[%s2849_s1 + $0x40] sm:$0xff] }
 0x607   :  { %v1551_v51 = vsel %vm28_vm0, %v1547_v23, 0.0  ;;  %2318 = vmatprep.subr.msk.mxu1 %vm28_vm0, %v2712_v5 }
 0x608   :  { %1552 = vadd.xlane.f32.xlu1 %v1551_v51  ;;  %v1548_v52 = vsel %vm28_vm0, %v1546_v50, 0.0  ;;  %2319 = vmatpush3.xpose.msk.msra.mxu1 %vm28_vm0, %v2712_v5 }
 0x609   :  { %1549 = vadd.xlane.f32.xlu0 %v1548_v52 }
 0x695   :  { %v1553_v53 = vpop.xlane.xlu1 %1552 }
 0x696   :  { %v1556_v54 = vmul.f32 0.03125, %v1553_v53  ;;  %v1550_v55 = vpop.xlane.xlu0 %1549 }
 0x697   :  { %v1555_v56 = vmul.f32 0.03125, %v1550_v55 }
 0x698   :  { %v1558_v57 = vsub.f32 %v1547_v23, %v1556_v54 }
 0x699   :  { %v1557_v58 = vsub.f32 %v1546_v50, %v1555_v56 }
 0x69a   :  { %v1560_v61 = vmul.f32 %v1558_v57, %v1558_v57 }
 0x69b   :  { %v1559_v59 = vmul.f32 %v1557_v58, %v1557_v58 }
 0x69c   :  { %v1564_v7 = vsel %vm28_vm0, %v1560_v61, 0.0 }
 0x69d   :  { %v1561_v60 = vsel %vm28_vm0, %v1559_v59, 0.0 }
 0x69e   :  { %1562 = vadd.xlane.f32.xlu0 %v1561_v60 }
 0x6a2   :  { %1565 = vadd.xlane.f32.xlu0 %v1564_v7 }
 0x72b   :  { %v1563_v62 = vpop.xlane.xlu0 %1562 }
 0x72c   :  { %v1567_v63 = vmul.f32 0.03125, %v1563_v62 }
 0x72e   :  { %v1569_v0 = vadd.f32 1e-05, %v1567_v63 }
 0x72f   :  { %v1566_v1 = vpop.xlane.xlu0 %1565 }
 0x730   :  { %2409 = vrsqrt.f32 %v1569_v0  ;;  %v1568_v2 = vmul.f32 0.03125, %v1566_v1 }
 0x732   :  { %v1570_v3 = vadd.f32 1e-05, %v1568_v2 }
 0x734   :  { %2411 = vrsqrt.f32 %v1570_v3  ;;  %v2465_v3 = vmov 683565275  }
 0x73a   :  { %v2410_v10 = vpop.eup %2409 }
 0x73b   :  { %v1573_v12 = vmul.f32 %v2410_v10, %v1557_v58  ;;  %v2466_v10 = vmov 2475754826  }
 0x73d   :  { %v1579_v15 = vmul.f32 %v1578_v8, %v1573_v12 }
 0x73e   :  { %v2412_v16 = vpop.eup %2411 }
 0x73f   :  { %v1574_v14 = vmul.f32 %v2412_v16, %v1558_v57  ;;  %v2722_v17 = vadd.f32 %v1584_v13, %v1579_v15  ;;  %v2468_v16 = vmov 2102212464  }
 0x741   :  { %v1580_v18 = vmul.f32 %v1578_v8, %v1574_v14  ;;  %2320 = vmatprep.mubr.msk.f32.mxu1 %vm28_vm0, %v2722_v17 }
 0x743   :  { %v2726_v19 = vadd.f32 %v1584_v13, %v1580_v18  ;;  %v2467_v13 = vmov 2131351028   ;;  %v2469_v18 = vmov 920167782  }
 0x745   :  { %2321 = vmatmul.mubr.msk.f32.vlgmr.msra.gmra.mrb[18].mxu1 %vm28_vm0, %v2726_v19 }
 0x818   :  { %v2322_v24 = vpop.f32.mrb[18].mxu1 }
 0x819   :  { %v1672_v25 = vadd.f32 %v2322_v24, %v1590_v21  ;;  %v1666_v26 = vpop.f32.mrb[19].mxu1 }
 0x81a   :  { %v1667_v27 = vadd.f32 %v1666_v26, %v1590_v21 }
 0x81b   :  { %v1679_v28 = vsel %vm1675_vm5, %v1672_v25, inf  ;;  %v1685_v31 = vsel %vm1675_vm5, %v1672_v25, -inf }
 0x81c   :  { %1680 = vmin.xlane.f32.xlu1 %v1679_v28  ;;  %v1682_v29 = vsel %vm1675_vm5, %v1667_v27, -inf  ;;  %v1676_v30 = vsel %vm1675_vm5, %v1667_v27, inf  ;;  %v2470_v28 = vmov 1326507024  }
 0x81d   :  { %1683 = vmax.xlane.f32.xlu0 %v1682_v29 }
 0x820   :  { %1677 = vmin.xlane.f32.xlu1 %v1676_v30 }
 0x821   :  { %1686 = vmax.xlane.f32.xlu0 %v1685_v31 }
 0x831   :  { %1701 = vrot.lane.b32.xlu1 %v1590_v21, %s2464_s12 }
 0x8a9   :  { %v1681_v11 = vpop.xlane.xlu1 %1680 }
 0x8aa   :  { %v1684_v32 = vpop.xlane.xlu0 %1683  ;;  %v1689_v41 = vsub.f32 %v1672_v25, %v1681_v11 }
 0x8ad   :  { %v1678_v33 = vpop.xlane.xlu1 %1677 }
 0x8ae   :  { %v1690_v34 = vsub.f32 %v1684_v32, %v1678_v33  ;;  %v1687_v35 = vpop.xlane.xlu0 %1686  ;;  %v1688_v39 = vsub.f32 %v1667_v27, %v1678_v33 }
 0x8af   :  { %v1691_v36 = vsub.f32 %v1687_v35, %v1681_v11 }
 0x8b0   :  { %v1692_v37 = vadd.f32 1e-08, %v1690_v34 }
 0x8b1   :  { %v1693_v38 = vadd.f32 1e-08, %v1691_v36  ;;  %v1702_v45 = vpop.permute.xlu1 %1701 }
 0x8b2   :  { %2413 = vrcp.f32 %v1692_v37 }
 0x8b3   :  { %2415 = vrcp.f32 %v1693_v38 }
 0x8bc   :  { %v2414_v40 = vpop.eup %2413 }
 0x8bd   :  { %v2416_v42 = vpop.eup %2415  ;;  %v1696_v43 = vmul.f32 %v2414_v40, %v1688_v39 }
 0x8be   :  { %v1697_v44 = vmul.f32 %v2416_v42, %v1689_v41 }
 0x8bf   :  { %v1698_v46 = vmul.f32 3.1415927, %v1696_v43 }
 0x8c0   :  { %v1699_v47 = vmul.f32 3.1415927, %v1697_v44 }
 0x8c1   :  { %v2736_v48 = vadd.f32 %v1702_v45, %v1698_v46 }
 0x8c2   :  { %v2738_v49 = vadd.f32 %v1702_v45, %v1699_v47 }
 0x8c3   :  { %v1706_v22 = vand.u32 2147483647, %v2736_v48  ;;  %v1709_v23 = vand.u32 2139095040, %v2736_v48 }
 0x8c4   :  { %v1812_v50 = vand.u32 2139095040, %v2738_v49  ;;  %v1809_v53 = vand.u32 2147483647, %v2738_v49 }
 0x8c5   :  { %v1710_v51 = vshrl.u32 %v1709_v23, 23  ;;  %v1713_v52 = vand.u32 8388607, %v1706_v22 }
 0x8c6   :  { %v1813_v54 = vshrl.u32 %v1812_v50, 23  ;;  %v2748_v59 = vand.u32 8388607, %v1809_v53 }
 0x8c7   :  { %v2155_v55 = vadd.s32 4294967169, %v1710_v51  ;;  %v1714_v58 = vor.u32 8388608, %v1713_v52 }
 0x8c8   :  { %v2159_v56 = vadd.s32 4294967169, %v1813_v54  ;;  %v1817_v1 = vor.u32 8388608, %v2748_v59 }
 0x8c9   :  { %v1716_v57 = vadd.s32 1, %v2155_v55  ;;  %v2750_v0 = vshll.u32 %v1714_v58, 8 }
 0x8ca   :  { %v1819_v60 = vadd.s32 1, %v2159_v56 }
 0x8cb   :  { %vm1717_vm6 = vcmp.gt.s32.totalorder %v1716_v57, 0 }
 0x8cc   :  { %v1718_v61 = vsel %vm1717_vm6, %v1716_v57, 0  ;;  %vm1820_vm7 = vcmp.gt.s32.totalorder %v1819_v60, 0  ;;  %vm1708_vm6 = vcmp.lt.s32.totalorder %v2736_v48, 0 }
 0x8cd   :  { %v1719_v7 = vshrl.u32 %v1718_v61, 5  ;;  %v1720_v62 = vand.u32 31, %v1718_v61  ;;  %v1821_v63 = vsel %vm1820_vm7, %v1819_v60, 0  ;;  %vm2791_vm7 = vcmp.le.f32.partialorder %v1706_v22, 0.7853982 }
 0x8ce   :  { %v2753_v6 = vshrl.u32 %v1821_v63, 5  ;;  %v1823_v8 = vand.u32 31, %v1821_v63 }
 0x8cf   :  { %v1721_v2 = vsub.s32 32, %v1720_v62  ;;  %v1723_v4 = vshll.u32 %v2465_v3, %v1720_v62  ;;  %v1726_v12 = vshll.u32 %v2466_v10, %v1720_v62  ;;  %v1729_v15 = vshll.u32 %v2467_v13, %v1720_v62 }
 0x8d0   :  { %v1732_v14 = vshll.u32 %v2468_v16, %v1720_v62  ;;  %v1735_v20 = vshll.u32 %v2469_v18, %v1720_v62  ;;  %vm1738_vm8 = vcmp.lt.s32.totalorder %v1719_v7, 1  ;;  %vm1739_vm9 = vcmp.lt.s32.totalorder %v1719_v7, 2 }
 0x8d1   :  { %v1724_v21 = vshrl.u32 %v2466_v10, %v1721_v2  ;;  %v1727_v24 = vshrl.u32 %v2467_v13, %v1721_v2  ;;  %v1730_v25 = vshrl.u32 %v2468_v16, %v1721_v2  ;;  %v1722_v26 = vshrl.u32 %v2465_v3, %v1721_v2 }
 0x8d2   :  { %v1733_v27 = vshrl.u32 %v2469_v18, %v1721_v2  ;;  %v1736_v29 = vshrl.u32 %v2470_v28, %v1721_v2  ;;  %v1824_v32 = vsub.s32 32, %v1823_v8  ;;  %vm1740_vm10 = vcmp.lt.s32.totalorder %v1719_v7, 3 }
 0x8d3   :  { %v1725_v30 = vor.u32 %v1724_v21, %v1723_v4  ;;  %v1728_v31 = vor.u32 %v1727_v24, %v1726_v12  ;;  %v1731_v11 = vor.u32 %v1730_v25, %v1729_v15  ;;  %vm1741_vm11 = vcmp.lt.s32.totalorder %v1719_v7, 4 }
 0x8d4   :  { %v1734_v33 = vor.u32 %v1733_v27, %v1732_v14  ;;  %v1737_v34 = vor.u32 %v1736_v29, %v1735_v20  ;;  %v1826_v42 = vshll.u32 %v2465_v3, %v1823_v8  ;;  %v1827_v45 = vshrl.u32 %v2466_v10, %v1824_v32 }
 0x8d5   :  { %v1742_v35 = vsel %vm1738_vm8, %v1722_v26, %v1725_v30  ;;  %v1743_v36 = vsel %vm1741_vm11, %v1731_v11, 2102212464  ;;  %v1746_v37 = vsel %vm1738_vm8, %v1725_v30, %v1728_v31  ;;  %v1750_v38 = vsel %vm1738_vm8, %v1728_v31, %v1731_v11 }
 0x8d6   :  { %v1744_v39 = vsel %vm1740_vm10, %v1728_v31, %v1743_v36  ;;  %v1747_v40 = vsel %vm1741_vm11, %v1734_v33, 920167782  ;;  %v1751_v41 = vsel %vm1741_vm11, %v1737_v34, 1326507024  ;;  %v1829_v46 = vshll.u32 %v2466_v10, %v1823_v8 }
 0x8d7   :  { %v1748_v43 = vsel %vm1740_vm10, %v1731_v11, %v1747_v40  ;;  %v1752_v44 = vsel %vm1740_vm10, %v1734_v33, %v1751_v41  ;;  %v1745_v47 = vsel %vm1739_vm9, %v1742_v35, %v1744_v39  ;;  %v1830_v51 = vshrl.u32 %v2467_v13, %v1824_v32 }
 0x8d8   :  { %v1749_v23 = vsel %vm1739_vm9, %v1746_v37, %v1748_v43  ;;  %v1753_v50 = vsel %vm1739_vm9, %v1750_v38, %v1752_v44  ;;  %v1828_v57 = vor.u32 %v1827_v45, %v1826_v42  ;;  %v1832_v59 = vshll.u32 %v2467_v13, %v1823_v8 }
 0x8d9   :  { %v2762_v52 = vmul.u32.u64.low %v2750_v0, %v1753_v50  ;;  %v2763_v54 = vmul.u32.u64.high %v2750_v0, %v1753_v50, %v2762_v52  ;;  %v2766_v55 = vmul.u32.u64.low %v2750_v0, %v1749_v23  ;;  %v2767_v56 = vmul.u32.u64.high %v2750_v0, %v1749_v23, %v2766_v55 }
 0x8da   :  { %v1831_v58 = vor.u32 %v1830_v51, %v1829_v46  ;;  %v1833_v60 = vshrl.u32 %v2468_v16, %v1824_v32  ;;  %v1835_v61 = vshll.u32 %v2468_v16, %v1823_v8  ;;  %v1836_v62 = vshrl.u32 %v2469_v18, %v1824_v32 }
 0x8db   :  { %v1839_v63 = vshrl.u32 %v2470_v28, %v1824_v32  ;;  %v1857_v2 = vshll.u32 %v1817_v1, 8  ;;  %v1761_v7 = vmul.u32 %v2750_v0, %v1745_v47  ;;  %v1825_v4 = vshrl.u32 %v2465_v3, %v1824_v32 }
 0x8dc   :  { %v1834_v10 = vor.u32 %v1833_v60, %v1832_v59  ;;  %v1838_v12 = vshll.u32 %v2469_v18, %v1823_v8  ;;  %vm1763_vm12 = vc.u32 %v2763_v54, %v2766_v55  ;;  %v1764_v15 = vadd.s32 1, %v2767_v56 }
 0x8dd   :  { %v1837_v14 = vor.u32 %v1836_v62, %v1835_v61  ;;  %vm1841_vm13 = vcmp.lt.s32.totalorder %v2753_v6, 1  ;;  %vm1843_vm14 = vcmp.lt.s32.totalorder %v2753_v6, 3  ;;  %vm1844_vm15 = vcmp.lt.s32.totalorder %v2753_v6, 4 }
 0x8de   :  { %v1840_v20 = vor.u32 %v1839_v63, %v1838_v12  ;;  %v1849_v13 = vsel %vm1841_vm13, %v1828_v57, %v1831_v58  ;;  %v1765_v1 = vsel %vm1763_vm12, %v1764_v15, %v2767_v56  ;;  %v1846_v16 = vsel %vm1844_vm15, %v1834_v10, 2102212464 }
 0x8df   :  { %v1850_v0 = vsel %vm1844_vm15, %v1837_v14, 920167782  ;;  %v1853_v3 = vsel %vm1841_vm13, %v1831_v58, %v1834_v10  ;;  %v1766_v21 = vadd.s32 %v1765_v1, %v1761_v7  ;;  %vm1842_vm1 = vcmp.lt.s32.totalorder %v2753_v6, 2 }
 0x8e0   :  { %v1851_v8 = vsel %vm1843_vm14, %v1834_v10, %v1850_v0  ;;  %v1854_v18 = vsel %vm1844_vm15, %v1840_v20, 1326507024  ;;  %v1845_v24 = vsel %vm1841_vm13, %v1825_v4, %v1828_v57  ;;  %v1847_v25 = vsel %vm1843_vm14, %v1831_v58, %v1846_v16 }
 0x8e1   :  { %v1852_v26 = vsel %vm1842_vm1, %v1849_v13, %v1851_v8  ;;  %v1855_v27 = vsel %vm1843_vm14, %v1837_v14, %v1854_v18  ;;  %v1767_v28 = vadd.s32 536870912, %v1766_v21  ;;  %v1848_v34 = vsel %vm1842_vm1, %v1845_v24, %v1847_v25 }
 0x8e2   :  { %v1856_v29 = vsel %vm1842_vm1, %v1853_v3, %v1855_v27  ;;  %v2777_v30 = vmul.u32.u64.low %v1857_v2, %v1852_v26  ;;  %v2778_v31 = vmul.u32.u64.high %v1857_v2, %v1852_v26, %v2777_v30  ;;  %v1864_v6 = vmul.u32 %v1857_v2, %v1848_v34 }
 0x8e3   :  { %v2780_v11 = vmul.u32.u64.low %v1857_v2, %v1856_v29  ;;  %v2781_v32 = vmul.u32.u64.high %v1857_v2, %v1856_v29, %v2780_v11  ;;  %v1768_v33 = vshrl.u32 %v1767_v28, 30  ;;  %v1762_v51 = vadd.s32 %v2766_v55, %v2763_v54 }
 0x8e4   :  { %v1867_v36 = vadd.s32 1, %v2778_v31  ;;  %vm1811_vm8 = vcmp.lt.s32.totalorder %v2738_v49, 0  ;;  %vm2803_vm9 = vcmp.le.f32.partialorder %v1809_v53, 0.7853982  ;;  %vm1798_vm13 = vweird.f32 %v2736_v48 }
 0x8e5   :  { %v1769_v35 = vshll.u32 %v1768_v33, 30  ;;  %vm1866_vm2 = vc.u32 %v2781_v32, %v2777_v30  ;;  %v1865_v15 = vadd.s32 %v2777_v30, %v2781_v32  ;;  %v1792_v18 = vsub.s32 4, %v1768_v33 }
 0x8e6   :  { %v1868_v38 = vsel %vm1866_vm2, %v1867_v36, %v2778_v31  ;;  %vm1901_vm2 = vweird.f32 %v2738_v49  ;;  %v1979_v8 = vsub.s32 4, %v2520_v9 }
 0x8e7   :  { %v1770_v37 = vsub.s32 %v1766_v21, %v1769_v35  ;;  %v1869_v39 = vadd.s32 %v1868_v38, %v1864_v6  ;;  %v1793_v28 = vsel %vm1708_vm6, %v1792_v18, %v1768_v33  ;;  %v2429_v18 = vld [vmem:[%s2849_s1 + $0x48] sm:$0xff]  ;;  %s2477_s1 = smov [#allocation2]  }
 0x8e8   :  { %v1795_v31 = vsel %vm2791_vm7, 0, %v1793_v28  ;;  %s2113_s21 = sshll.u32 %s2477_s1, 4  ;;  %s2114_s21 = int_to_ptr.vmem [resolvable:$true] %s2113_s21 }
 0x8e9   :  { %v1772_v40 = vsub.s32 0, %v1770_v37  ;;  %v1870_v41 = vadd.s32 536870912, %v1869_v39  ;;  %v1799_v34 = vand.u32 3, %v1795_v31  ;;  %s2430_s22 = scalar_lea.vmem %s2114_s21, 256  ;;  %p2435_p1 = scmp.lt.s32.totalorder %s2114_s21, %s2114_s21 }
 0x8ea   :  { %p2431_p0 = scmp.ne.s32.totalorder %s2114_s21, %s2430_s22  ;;  %p2436_p2 = scmp.lt.s32.totalorder %s2430_s22, %s2430_s22 }
 0x8eb   :  { %v2156_v42 = vmin.u32 %v1772_v40, %v1770_v37  ;;  %v1871_v43 = vshrl.u32 %v1870_v41, 30  ;;  %vm1804_vm10 = vcmp.eq.s32.totalorder %v1799_v34, 2  ;;  %vm1801_vm11 = vcmp.eq.s32.totalorder %v1799_v34, 0 }
 0x8ec   :  { %vm1800_vm12 = vcmp.lt.s32.totalorder %v1799_v34, 2  ;;  %p2437_p3 = por %p2436_p2, %p2435_p1 }
 0x8ed   :  { %v1774_v44 = vclz %v2156_v42  ;;  %v1872_v45 = vshll.u32 %v1871_v43, 30  ;;  %v1895_v32 = vsub.s32 4, %v1871_v43 }
 0x8ee   :  { %p2438_p4 = pnand %p2437_p3, %p2431_p0 }
 0x8ef   :  { %v2157_v46 = vadd.s32 4294967294, %v1774_v44  ;;  %v1873_v47 = vsub.s32 %v1869_v39, %v1872_v45 }
 0x8f1   :  { %vm2158_vm3 = vcmp.lt.s32.totalorder %v2157_v46, 0  ;;  %v1875_v50 = vsub.s32 0, %v1873_v47 }
 0x8f2   :  { %v1777_v23 = vsel %vm2158_vm3, 0, %v2157_v46  ;;  %vm1988_vm3 = vcmask 1043456  }
 0x8f3   :  { %v1778_v52 = vsub.s32 32, %v1777_v23  ;;  %v1782_v56 = vsub.s32 4294967266, %v1777_v23  ;;  %v2160_v57 = vmin.u32 %v1875_v50, %v1873_v47  ;;  %v1779_v58 = vshll.u32 %v1770_v37, %v1777_v23 }
 0x8f4   :  { %v1896_v37 = vsel %vm1811_vm8, %v1895_v32, %v1871_v43 }
 0x8f5   :  { %v1780_v59 = vshrl.u32 %v1762_v51, %v1778_v52  ;;  %v1783_v60 = vadd.s32 127, %v1782_v56  ;;  %v1877_v61 = vclz %v2160_v57  ;;  %v1898_v40 = vsel %vm2803_vm9, 0, %v1896_v37 }
 0x8f6   :  { %v1902_v44 = vand.u32 3, %v1898_v40  ;;  %v1981_v56 = vrot.slane %v2712_v5, 4 }
 0x8f7   :  { %v1781_v62 = vor.u32 %v1780_v59, %v1779_v58  ;;  %v1784_v63 = vshll.u32 %v1783_v60, 23  ;;  %v2161_v2 = vadd.s32 4294967294, %v1877_v61 }
 0x8f8   :  { %vm1907_vm14 = vcmp.eq.s32.totalorder %v1902_v44, 2  ;;  %vm1904_vm15 = vcmp.eq.s32.totalorder %v1902_v44, 0  ;;  %vm1903_vm1 = vcmp.lt.s32.totalorder %v1902_v44, 2  ;;  %2323 = vmatprep.subr.msk.mxu1 %vm1988_vm3, %v1981_v56  ;;  %v2096_v44 = vsub.s32 5, %v2520_v9 }
 0x8f9   :  { %v1785_v7 = vor.u32 4788187, %v1784_v63  ;;  %vm2162_vm4 = vcmp.lt.s32.totalorder %v2161_v2, 0  ;;  %v1788_v10 = vcvt.s32.f32 %v1781_v62  ;;  %2324 = vmatpush3.msk.msra.mxu1 %vm1988_vm3, %v1981_v56 }
 0x8fa   :  { %v1880_v12 = vsel %vm2162_vm4, 0, %v2161_v2  ;;  %vm1968_vm4 = vcmask 7168  }
 0x8fb   :  { %v1786_v4 = vand.u32 2147483647, %v1785_v7  ;;  %v1881_v14 = vsub.s32 32, %v1880_v12  ;;  %v1885_v20 = vsub.s32 4294967266, %v1880_v12  ;;  %v1882_v55 = vshll.u32 %v1873_v47, %v1880_v12 }
 0x8fd   :  { %v1789_v54 = vmul.f32 %v1788_v10, %v1786_v4  ;;  %v1883_v13 = vshrl.u32 %v1865_v15, %v1881_v14  ;;  %v1886_v1 = vadd.s32 127, %v1885_v20 }
 0x8ff   :  { %v1790_v16 = vxor.u32 2147483648, %v1789_v54  ;;  %v1884_v0 = vor.u32 %v1883_v13, %v1882_v55  ;;  %v1887_v3 = vshll.u32 %v1886_v1, 23 }
 0x901   :  { %v1791_v21 = vsel %vm1708_vm6, %v1790_v16, %v1789_v54  ;;  %v1888_v24 = vor.u32 4788187, %v1887_v3  ;;  %v1891_v27 = vcvt.s32.f32 %v1884_v0  ;;  %vm1971_vm6 = vcmask 15360  }
 0x902   :  { %v1794_v25 = vsel %vm2791_vm7, %v2736_v48, %v1791_v21  ;;  %vm1974_vm7 = vcmask 23552  }
 0x903   :  { %2417 = vcosq.f32 %v1794_v25  ;;  %v1889_v26 = vand.u32 2147483647, %v1888_v24  ;;  %v1980_v24 = vrot.slane %v2429_v18, %v1979_v8 }
 0x904   :  { %2419 = vsinq.f32 %v1794_v25 }
 0x905   :  { %v1892_v29 = vmul.f32 %v1891_v27, %v1889_v26 }
 0x907   :  { %v1893_v30 = vxor.u32 2147483648, %v1892_v29 }
 0x909   :  { %v1894_v22 = vsel %vm1811_vm8, %v1893_v30, %v1892_v29 }
 0x90a   :  { %v1897_v33 = vsel %vm2803_vm9, %v2738_v49, %v1894_v22 }
 0x90b   :  { %2421 = vcosq.f32 %v1897_v33 }
 0x90c   :  { %2423 = vsinq.f32 %v1897_v33 }
 0x90d   :  { %v2418_v35 = vpop.eup %2417 }
 0x90e   :  { %v2420_v36 = vpop.eup %2419  ;;  %v1805_v6 = vxor.u32 2147483648, %v2418_v35 }
 0x90f   :  { %v1802_v38 = vxor.u32 2147483648, %v2420_v36 }
 0x910   :  { %v1806_v39 = vsel %vm1804_vm10, %v1805_v6, %v2420_v36 }
 0x911   :  { %v1803_v53 = vsel %vm1801_vm11, %v2418_v35, %v1802_v38 }
 0x912   :  { %v1807_v41 = vsel %vm1800_vm12, %v1803_v53, %v1806_v39 }
 0x913   :  { %v1808_v42 = vsel %vm1798_vm13, nan, %v1807_v41 }
 0x914   :  { %1914 = vrot.lane.b32.xlu0 %v1808_v42, %s2471_s13 }
 0x915   :  { %v2422_v45 = vpop.eup %2421 }
 0x916   :  { %v2424_v46 = vpop.eup %2423  ;;  %v1908_v43 = vxor.u32 2147483648, %v2422_v45 }
 0x917   :  { %v1905_v47 = vxor.u32 2147483648, %v2424_v46 }
 0x918   :  { %v1909_v23 = vsel %vm1907_vm14, %v1908_v43, %v2424_v46  ;;  %v2097_v46 = vrot.slane %v2429_v18, %v2096_v44 }
 0x919   :  { %v1906_v50 = vsel %vm1904_vm15, %v2422_v45, %v1905_v47  ;;  %v2102_v45 = vsub.s32 6, %v2520_v9 }
 0x91a   :  { %v1910_v51 = vsel %vm1903_vm1, %v1906_v50, %v1909_v23 }
 0x91b   :  { %v1911_v52 = vsel %vm1901_vm2, nan, %v1910_v51  ;;  %v2103_v50 = vrot.slane %v2429_v18, %v2102_v45 }
 0x91c   :  { %1916 = vrot.lane.b32.xlu1 %v1911_v52, %s2471_s13  ;;  %1924 = vrot.lane.b32.xlu0 %v1911_v52, %s2472_s14 }
 0x920   :  { %1922 = vrot.lane.b32.xlu1 %v1808_v42, %s2472_s14  ;;  %1932 = vrot.lane.b32.xlu0 %v1911_v52, %s2473_s15 }
 0x924   :  { %1930 = vrot.lane.b32.xlu1 %v1808_v42, %s2473_s15 }
 0x986   :  { %v1915_v48 = vpop.permute.xlu0 %1914 }
 0x987   :  { %v1920_v61 = vmul.f32 %v1915_v48, %v1808_v42 }
 0x98e   :  { %v1917_v57 = vpop.permute.xlu1 %1916  ;;  %v1925_v58 = vpop.permute.xlu0 %1924 }
 0x98f   :  { %v1921_v59 = vmul.f32 %v1917_v57, %v1911_v52 }
 0x991   :  { %1950 = vrot.lane.b32.xlu0 %v1921_v59, %s2474_s16  ;;  %v1929_v49 = vmul.f32 %v1925_v58, %v1921_v59 }
 0x992   :  { %v1923_v60 = vpop.permute.xlu1 %1922  ;;  %v1933_v63 = vpop.permute.xlu0 %1932 }
 0x993   :  { %1942 = vrot.lane.b32.xlu1 %v1929_v49, %s2471_s13  ;;  %v1928_v62 = vmul.f32 %v1923_v60, %v1920_v61  ;;  %v1937_v2 = vmul.f32 %v1933_v63, %v1929_v49 }
 0x995   :  { %1948 = vrot.lane.b32.xlu0 %v1920_v61, %s2474_s16 }
 0x996   :  { %v1931_v5 = vpop.permute.xlu1 %1930 }
 0x997   :  { %1940 = vrot.lane.b32.xlu1 %v1928_v62, %s2471_s13  ;;  %v1936_v7 = vmul.f32 %v1931_v5, %v1928_v62 }
 0x999   :  { %1956 = vrot.lane.b32.xlu0 %v1929_v49, %s2475_s17 }
 0x99b   :  { %1954 = vrot.lane.b32.xlu1 %v1928_v62, %s2475_s17 }
 0x99d   :  { %1964 = vrot.lane.b32.xlu0 %v1937_v2, %s2476_s18 }
 0x99f   :  { %1962 = vrot.lane.b32.xlu1 %v1936_v7, %s2476_s18 }
 0xa03   :  { %v1951_v4 = vpop.permute.xlu0 %1950 }
 0xa05   :  { %v1943_v10 = vpop.permute.xlu1 %1942 }
 0xa06   :  { %v1970_v13 = vsel %vm1968_vm4, %v1943_v10, %v1951_v4 }
 0xa07   :  { %v1949_v12 = vpop.permute.xlu0 %1948 }
 0xa09   :  { %v1941_v15 = vpop.permute.xlu1 %1940 }
 0xa0a   :  { %v1969_v54 = vsel %vm1968_vm4, %v1941_v15, %v1949_v12 }
 0xa0b   :  { %v1957_v14 = vpop.permute.xlu0 %1956 }
 0xa0c   :  { %v1973_v0 = vsel %vm1971_vm6, %v1970_v13, %v1957_v14 }
 0xa0d   :  { %v1955_v20 = vpop.permute.xlu1 %1954 }
 0xa0e   :  { %v1972_v1 = vsel %vm1971_vm6, %v1969_v54, %v1955_v20 }
 0xa0f   :  { %v1965_v55 = vpop.permute.xlu0 %1964 }
 0xa10   :  { %v1976_v21 = vsel %vm1974_vm7, %v1973_v0, %v1965_v55 }
 0xa11   :  { %v1963_v16 = vpop.permute.xlu1 %1962 }
 0xa12   :  { %v1975_v3 = vsel %vm1974_vm7, %v1972_v1, %v1963_v16 }
 0xa13   :  { %2325 = vmatprep.mubr.msk.f32.mxu1 %vm1675_vm5, %v1975_v3 }
 0xa14   :  { %2326 = vmatmul.mubr.msk.f32.vlgmr.msra.gmra.mrb[20].mxu1 %vm1675_vm5, %v1976_v21 }
 0xae7   :  { %v2327_v25 = vpop.f32.mrb[20].mxu1 }
 0xae8   :  { %v2063_v26 = vadd.f32 %v2327_v25, %v1980_v24  ;;  %v2057_v27 = vpop.f32.mrb[21].mxu1 }
 0xae9   :  { %v2058_v28 = vadd.f32 %v2057_v27, %v1980_v24 }
 0xaea   :  { %v2067_v29 = vadd.f32 %v2063_v26, %v2726_v19 }
 0xaeb   :  { %v2066_v30 = vadd.f32 %v2058_v28, %v2722_v17 }
 0xaec   :  { %v2071_v31 = vsel %vm28_vm0, %v2067_v29, 0.0 }
 0xaed   :  { %2072 = vadd.xlane.f32.xlu0 %v2071_v31  ;;  %v2068_v22 = vsel %vm28_vm0, %v2066_v30, 0.0 }
 0xaee   :  { %2069 = vadd.xlane.f32.xlu1 %v2068_v22 }
 0xb7a   :  { %v2073_v11 = vpop.xlane.xlu0 %2072 }
 0xb7b   :  { %v2075_v32 = vmul.f32 0.03125, %v2073_v11  ;;  %v2070_v34 = vpop.xlane.xlu1 %2069 }
 0xb7c   :  { %v2074_v33 = vmul.f32 0.03125, %v2070_v34 }
 0xb7d   :  { %v2077_v35 = vsub.f32 %v2067_v29, %v2075_v32 }
 0xb7e   :  { %v2076_v36 = vsub.f32 %v2066_v30, %v2074_v33 }
 0xb7f   :  { %v2079_v6 = vmul.f32 %v2077_v35, %v2077_v35 }
 0xb80   :  { %v2078_v37 = vmul.f32 %v2076_v36, %v2076_v36 }
 0xb81   :  { %v2083_v38 = vsel %vm28_vm0, %v2079_v6, 0.0 }
 0xb82   :  { %2084 = vadd.xlane.f32.xlu1 %v2083_v38  ;;  %v2080_v19 = vsel %vm28_vm0, %v2078_v37, 0.0 }
 0xb83   :  { %2081 = vadd.xlane.f32.xlu0 %v2080_v19 }
 0xc0f   :  { %v2085_v17 = vpop.xlane.xlu1 %2084 }
 0xc10   :  { %v2087_v39 = vmul.f32 0.03125, %v2085_v17  ;;  %v2082_v53 = vpop.xlane.xlu0 %2081 }
 0xc11   :  { %v2086_v40 = vmul.f32 0.03125, %v2082_v53 }
 0xc12   :  { %v2089_v41 = vadd.f32 1e-05, %v2087_v39 }
 0xc13   :  { %v2088_v42 = vadd.f32 1e-05, %v2086_v40 }
 0xc14   :  { %2425 = vrsqrt.f32 %v2089_v41 }
 0xc15   :  { %2427 = vrsqrt.f32 %v2088_v42 }
 0xc1e   :  { %v2426_v43 = vpop.eup %2425 }
 0xc1f   :  { %v2428_v47 = vpop.eup %2427  ;;  %v2093_v23 = vmul.f32 %v2426_v43, %v2077_v35 }
 0xc20   :  { %v2092_v51 = vmul.f32 %v2428_v47, %v2076_v36 }
 0xc21   :  { %v2099_v52 = vmul.f32 %v2097_v46, %v2093_v23 }
 0xc22   :  { %v2098_v48 = vmul.f32 %v2097_v46, %v2092_v51 }
 0xc23   :  { %v2105_v56 = vadd.f32 %v2103_v50, %v2099_v52 }
 0xc24   :  { %v2104_v57 = vadd.f32 %v2103_v50, %v2098_v48 }
 0xc25   :  { %2107 = vst.msk [vmem:[#allocation2 + $0x8] sm:$0xff] %vm28_vm0, %v2105_v56 }
 0xc26   :  { %2106 = vst.msk [vmem:[#allocation2] sm:$0xff] %vm28_vm0, %v2104_v57 }
 0xc27   :  { %2441 = shalt.err (!%p2438_p4)
}
 0xc28   :  { %s2442_s24 = scalar_lea.hbm %s2850_s2, 256 }
 0xc29   :  { %p2443_p5 = scmp.ne.s32.totalorder %s2850_s2, %s2442_s24  ;;  %p2446_p6 = scmp.lt.u32.totalorder %s2442_s24, %s2850_s2 }
 0xc2b   :  { %p2448_p7 = pnand %p2446_p6, %p2443_p5 }
 0xc2d   :  { %2451 = shalt.err (!%p2448_p7)
}
 0xc2e   :  { %s2478_s29 = smov 128  }
 0xc2f   :  { %2119 = dma.vmem_to_hbm [thread:$0]  %s2114_s21, 256, %s2850_s2, [#allocation3], %s2478_s29, %s2478_s29, %s2461_s7  }
 0xc30   :  { %2452 = dma.done.wait [#allocation3], 256  }
 0xc31   :  { %2453 = vsyncadd [#allocation3], 4294967040 }
 0xc32   :  { %2123 = vsyncpa [#allocation3], 1 }

</bundles_post_ra>
